<compile_context>
chip_gen: v7x
topology: tpu7x:2x2x1
jax: 0.10.0
libtpu: 0.0.40
codegen_flags: <defaults>
</compile_context>

<pallas_src>
import math
import functools

import jax
import jax.numpy as jnp
from jax import lax
from jax.experimental import pallas as pl
from jax.experimental.pallas import tpu as pltpu


def _layernorm(x, gamma, beta, eps=1e-5):
    mean = jnp.mean(x, axis=-1, keepdims=True)
    c = x - mean
    var = jnp.mean(c * c, axis=-1, keepdims=True)
    return c * lax.rsqrt(var + eps) * gamma + beta


def encoder_stack_kernel(x0_ref, wqkv_ref, bqkv_ref, w0_ref, vecs_ref,
                         w1_ref, bf1_ref, w2_ref, out_ref,
                         *, batch, seq, heads, dim_head):
    """Entire encoder stack.  grid=(n_layers,).

    out_ref's block index is constant across the layer axis so it stays
    resident in VMEM and is the activation carry.  x0 (emb*sqrt(d)+pe from the
    wrapper) aliases the output HBM buffer and is only read at layer 0.

    Packed per-layer params:
      wqkv (D, 3D) bf16, bqkv (1, 3D) f32   fused Q|K|V projection
      w0   (D, D)  bf16
      vecs (8, D)  f32  rows: [b0, ln1_g, ln1_b, ln2_g, ln2_b, b2, pad, pad]
      w1 (D, H) bf16, bf1 (1, H) f32, w2 (H, D) bf16
    """
    layer = pl.program_id(0)

    @pl.when(layer == 0)
    def _():
        out_ref[...] = x0_ref[...]

    x = out_ref[...]                               # (B*S, D) f32 resident carry
    d_model = x.shape[-1]
    xb = x.astype(jnp.bfloat16)

    # --- fused Q/K/V projection: one (B*S, D) @ (D, 3D) matmul --------------
    qkv = (jnp.dot(xb, wqkv_ref[...], preferred_element_type=jnp.float32)
           + bqkv_ref[...])
    qkv3 = qkv.reshape(batch, seq, 3 * d_model)

    # --- attention -----------------------------------------------------------
    # TODO(synk): a single 'bihd,bjhd->bhij' einsum (two batch dims) / 4-D
    # transpose does not reliably lower in Mosaic, so the head relayout is an
    # explicit static head loop of 1-batch-dim einsums instead.
    scale = dim_head ** (-0.5)
    head_outs = []
    for h in range(heads):
        q_h = qkv3[:, :, h * dim_head:(h + 1) * dim_head]
        k_h = qkv3[:, :, d_model + h * dim_head:d_model + (h + 1) * dim_head]
        v_h = qkv3[:, :, 2 * d_model + h * dim_head:
                   2 * d_model + (h + 1) * dim_head]
        s = jnp.einsum('bid,bjd->bij', q_h, k_h,
                       preferred_element_type=jnp.float32) * scale    # (B,S,S)
        s = s - jnp.max(s, axis=-1, keepdims=True)
        e = jnp.exp(s)
        p = e * pl.reciprocal(jnp.sum(e, axis=-1, keepdims=True), approx=True)
        head_outs.append(jnp.einsum('bij,bjd->bid', p, v_h,
                                    preferred_element_type=jnp.float32))

    # merge 'b h v d -> b v (h d)' into ONE (B*S, D) tensor, then a single
    # full-width output projection.
    o = jnp.concatenate(head_outs, axis=-1).reshape(batch * seq, d_model)
    attn = (jnp.dot(o.astype(jnp.bfloat16), w0_ref[...],
                    preferred_element_type=jnp.float32) + vecs_ref[0:1, :])

    # --- Add & Norm 1 (dropout == identity in inference) --------------------
    y = _layernorm(x + attn, vecs_ref[1:2, :], vecs_ref[2:3, :])

    # --- FeedForward: relu(y@W1+b1)@W2+b2; keep only the bf16 hidden live ----
    hid = jnp.maximum(
        jnp.dot(y.astype(jnp.bfloat16), w1_ref[...],
                preferred_element_type=jnp.float32) + bf1_ref[...],
        0.0).astype(jnp.bfloat16)
    ff = (jnp.dot(hid, w2_ref[...], preferred_element_type=jnp.float32)
          + vecs_ref[5:6, :])

    # --- Add & Norm 2 ---------------------------------------------------------
    out_ref[...] = _layernorm(y + ff, vecs_ref[3:4, :], vecs_ref[4:5, :])


def make_pe_table(d_model, max_seq_len=80):
    # Reproduces the reference buffer exactly (div_term is NOT exponentiated in
    # the original code, so we do the same).
    pos = jnp.arange(max_seq_len, dtype=jnp.float32)[:, None]
    div = (jnp.arange(0, d_model, 2, dtype=jnp.float32)
           * (-math.log(10000.0) / d_model))
    pe = jnp.zeros((max_seq_len, d_model), jnp.float32)
    pe = pe.at[:, 0::2].set(jnp.sin(pos * div))
    pe = pe.at[:, 1::2].set(jnp.cos(pos * div))
    return pe


def init_encoder_params(key, vocab_size, d_model, n_layers, heads, hidden_dim):
    """Deterministic synthetic params, packed/stacked for the fused kernel."""
    dh = d_model // heads

    def linear(k, din, dout):
        kw, kb = jax.random.split(k)
        return (jax.random.normal(kw, (din, dout), jnp.float32) * 0.02,
                jax.random.normal(kb, (dout,), jnp.float32) * 0.02)

    keys = jax.random.split(key, n_layers + 1)
    emb_table = jax.random.normal(keys[0], (vocab_size, d_model), jnp.float32)

    # einops 'b v (d h) -> b h v d' (h innermost): permute projection columns so
    # head h occupies the contiguous block [h*dh, (h+1)*dh) after the fused
    # matmul; W0's row order already matches the '(h d)' merge.
    perm = jnp.arange(d_model).reshape(dh, heads).T.reshape(-1)

    ones = jnp.ones((d_model,), jnp.float32)
    zeros = jnp.zeros((d_model,), jnp.float32)

    per_layer = []
    for i in range(n_layers):
        lk = jax.random.split(keys[i + 1], 6)
        wq, bq = linear(lk[0], d_model, d_model)
        wk, bk = linear(lk[1], d_model, d_model)
        wv, bv = linear(lk[2], d_model, d_model)
        w0, b0 = linear(lk[3], d_model, d_model)
        w1, b1 = linear(lk[4], d_model, hidden_dim)
        w2, b2 = linear(lk[5], hidden_dim, d_model)

        wqkv = jnp.concatenate([wq[:, perm], wk[:, perm], wv[:, perm]], axis=1)
        bqkv = jnp.concatenate([bq[perm], bk[perm], bv[perm]])[None, :]
        # rows: b0, ln1_gamma, ln1_beta, ln2_gamma, ln2_beta, b2, pad, pad
        vecs = jnp.stack([b0, ones, zeros, ones, zeros, b2, zeros, zeros])

        per_layer.append(dict(
            wqkv=wqkv.astype(jnp.bfloat16),
            bqkv=bqkv.astype(jnp.float32),
            w0=w0.astype(jnp.bfloat16),
            vecs=vecs.astype(jnp.float32),
            w1=w1.astype(jnp.bfloat16),
            bf1=b1[None, :].astype(jnp.float32),
            w2=w2.astype(jnp.bfloat16),
        ))
    stacked = {k: jnp.stack([p[k] for p in per_layer]) for k in per_layer[0]}
    return emb_table, stacked


@functools.partial(jax.jit, static_argnames=("heads",))
def encoder_forward(tokens, emb_table, pe_table, params, *, heads):
    B, S = tokens.shape
    d_model = emb_table.shape[1]
    dh = d_model // heads
    n_layers = params["wqkv"].shape[0]

    # Embedding gather + positional encoding fused in the wrapper.  pe is
    # broadcast over the batch (never tiled to (B*S, D) in HBM); x0 is aliased
    # to the kernel's output carry.
    emb = jnp.take(emb_table, tokens, axis=0)                       # (B, S, D)
    x0 = (emb * math.sqrt(d_model) + pe_table[:S][None]).reshape(B * S, d_model)

    def per_layer(a):
        # leading layer axis selected by the grid index, squeezed in-kernel
        return pl.BlockSpec((None,) + a.shape[1:],
                            lambda l, n=a.ndim: (l,) + (0,) * (n - 1))

    names = ["wqkv", "bqkv", "w0", "vecs", "w1", "bf1", "w2"]
    weight_args = [params[n] for n in names]

    kernel = functools.partial(encoder_stack_kernel, batch=B, seq=S,
                               heads=heads, dim_head=dh)

    out = pl.pallas_call(
        kernel,
        out_shape=jax.ShapeDtypeStruct((B * S, d_model), jnp.float32),
        grid=(n_layers,),
        in_specs=[pl.BlockSpec((B * S, d_model), lambda l: (0, 0))]
                 + [per_layer(a) for a in weight_args],
        out_specs=pl.BlockSpec((B * S, d_model), lambda l: (0, 0)),
        input_output_aliases={0: 0},
        compiler_params=pltpu.CompilerParams(
            dimension_semantics=("arbitrary",),
            vmem_limit_bytes=32 * 1024 * 1024),
    )(x0, *weight_args)
    return out.reshape(B, S, d_model)


if __name__ == "__main__":
    vocab_size, d_model, n_layers, heads = 50, 32, 2, 8
    B, S = 2, 8
    hidden_dim = 2048   # FeedForward default in the reference module

    key = jax.random.PRNGKey(0)
    k_tok, k_param = jax.random.split(key)
    tokens = jax.random.randint(k_tok, (B, S), 0, vocab_size, dtype=jnp.int32)

    emb_table, params = init_encoder_params(
        k_param, vocab_size, d_model, n_layers, heads, hidden_dim)
    pe_table = make_pe_table(d_model)

    out = encoder_forward(tokens, emb_table, pe_table, params, heads=heads)
    out = jax.block_until_ready(out)
    assert out.shape == (B, S, d_model) and out.dtype == jnp.float32
    # TODO(synk): dropout layers are identity (inference); the reference's
    # pe[:, :seq_len] slice is a broadcasting bug and is implemented as
    # pe[:seq_len].
    print("KERNEL_OK")
</pallas_src>

<mosaic_0001>
module attributes {stable_mosaic.version = 11 : i64} {
  func.func @encoder_stack_kernel(%arg0: i32, %arg1: memref<16x32xf32, #tpu.memory_space<vmem>>, %arg2: memref<1x32x96xbf16, #tpu.memory_space<vmem>>, %arg3: memref<1x1x96xf32, #tpu.memory_space<vmem>>, %arg4: memref<1x32x32xbf16, #tpu.memory_space<vmem>>, %arg5: memref<1x8x32xf32, #tpu.memory_space<vmem>>, %arg6: memref<1x32x2048xbf16, #tpu.memory_space<vmem>>, %arg7: memref<1x1x2048xf32, #tpu.memory_space<vmem>>, %arg8: memref<1x2048x32xbf16, #tpu.memory_space<vmem>>, %arg9: memref<16x32xf32, #tpu.memory_space<vmem>>) attributes {dimension_semantics = [#tpu.dimension_semantics<arbitrary>], iteration_bounds = array<i64: 2>, scalar_prefetch = 0 : i64, scratch_operands = 0 : i64, tpu.core_type = #tpu.core_type<tc>, window_params = [{pipeline_mode = #tpu.pipeline_mode<synchronous>, transform_indices = @transform_0, window_bounds = array<i64: 16, 32>}, {transform_indices = @transform_1, window_bounds = array<i64: 1, 32, 96>}, {transform_indices = @transform_2, window_bounds = array<i64: 1, 1, 96>}, {transform_indices = @transform_3, window_bounds = array<i64: 1, 32, 32>}, {transform_indices = @transform_4, window_bounds = array<i64: 1, 8, 32>}, {transform_indices = @transform_5, window_bounds = array<i64: 1, 32, 2048>}, {transform_indices = @transform_6, window_bounds = array<i64: 1, 1, 2048>}, {transform_indices = @transform_7, window_bounds = array<i64: 1, 2048, 32>}, {pipeline_mode = #tpu.pipeline_mode<synchronous>, transform_indices = @transform_8, window_bounds = array<i64: 16, 32>}]} {
    %c0_i32 = arith.constant 0 : i32
    %0 = arith.cmpi eq, %arg0, %c0_i32 : i32
    %1 = arith.extui %0 : i1 to i32
    %c0_i32_0 = arith.constant 0 : i32
    %2 = arith.cmpi ne, %1, %c0_i32_0 : i32
    scf.if %2 {
      %c0_89 = arith.constant 0 : index
      %c0_90 = arith.constant 0 : index
      %228 = vector.load %arg1[%c0_89, %c0_90] : memref<16x32xf32, #tpu.memory_space<vmem>>, vector<16x32xf32>
      %c0_91 = arith.constant 0 : index
      %c0_92 = arith.constant 0 : index
      %229 = vector.load %arg9[%c0_91, %c0_92] : memref<16x32xf32, #tpu.memory_space<vmem>>, vector<16x32xf32>
      tpu.vector_store %arg9[%c0_91, %c0_92], %228 {strides = array<i32>} : memref<16x32xf32, #tpu.memory_space<vmem>>, vector<16x32xf32>,
    } else {
    }
    %c0 = arith.constant 0 : index
    %c0_1 = arith.constant 0 : index
    %3 = vector.load %arg9[%c0, %c0_1] : memref<16x32xf32, #tpu.memory_space<vmem>>, vector<16x32xf32>
    %4 = arith.truncf %3 : vector<16x32xf32> to vector<16x32xbf16>
    %c0_2 = arith.constant 0 : index
    %c0_3 = arith.constant 0 : index
    %c0_4 = arith.constant 0 : index
    %5 = vector.load %arg2[%c0_2, %c0_3, %c0_4] : memref<1x32x96xbf16, #tpu.memory_space<vmem>>, vector<1x32x96xbf16>
    %6 = vector.shape_cast %5 : vector<1x32x96xbf16> to vector<32x96xbf16>
    %cst = arith.constant dense<0.000000e+00> : vector<16x96xf32>
    %7 = tpu.matmul %4, %6, %cst {dimension_numbers = #tpu.dot_dimension_numbers<[1], [0], [0], [1], [0, 0, 1, 1], [], []>} : vector<16x32xbf16>, vector<32x96xbf16>, vector<16x96xf32> -> vector<16x96xf32>
    %c0_5 = arith.constant 0 : index
    %c0_6 = arith.constant 0 : index
    %c0_7 = arith.constant 0 : index
    %8 = vector.load %arg3[%c0_5, %c0_6, %c0_7] : memref<1x1x96xf32, #tpu.memory_space<vmem>>, vector<1x1x96xf32>
    %9 = vector.shape_cast %8 : vector<1x1x96xf32> to vector<1x96xf32>
    %10 = vector.broadcast %9 : vector<1x96xf32> to vector<16x96xf32>
    %11 = arith.addf %7, %10 : vector<16x96xf32>
    %12 = vector.shape_cast %11 : vector<16x96xf32> to vector<2x8x96xf32>
    %13 = vector.extract_strided_slice %12 {offsets = [0, 0, 0], sizes = [2, 8, 4], strides = [1, 1, 1]} : vector<2x8x96xf32> to vector<2x8x4xf32>
    %14 = vector.extract_strided_slice %12 {offsets = [0, 0, 32], sizes = [2, 8, 4], strides = [1, 1, 1]} : vector<2x8x96xf32> to vector<2x8x4xf32>
    %15 = vector.extract_strided_slice %12 {offsets = [0, 0, 64], sizes = [2, 8, 4], strides = [1, 1, 1]} : vector<2x8x96xf32> to vector<2x8x4xf32>
    "tpu.trace_start"() <{level = 10 : i32, message = "bid,bjd->bij"}> : () -> ()
    %cst_8 = arith.constant dense<0.000000e+00> : vector<2x8x8xf32>
    %16 = tpu.matmul %13, %14, %cst_8 {dimension_numbers = #tpu.dot_dimension_numbers<[2], [2], [1], [1], [0, 0, 0, 1, 1, 1], [0], [0]>} : vector<2x8x4xf32>, vector<2x8x4xf32>, vector<2x8x8xf32> -> vector<2x8x8xf32>
    "tpu.trace_stop"() : () -> ()
    %cst_9 = arith.constant 5.000000e-01 : f32
    %17 = vector.broadcast %cst_9 : f32 to vector<2x8x8xf32>
    %18 = arith.mulf %16, %17 : vector<2x8x8xf32>
    %cst_10 = arith.constant dense<0xFF800000> : vector<2x8xf32>
    %19 = vector.multi_reduction <maximumf>, %18, %cst_10 [2] : vector<2x8x8xf32> to vector<2x8xf32>
    %20 = vector.shape_cast %19 : vector<2x8xf32> to vector<2x8x1xf32>
    %21 = vector.broadcast %20 : vector<2x8x1xf32> to vector<2x8x8xf32>
    %22 = arith.subf %18, %21 : vector<2x8x8xf32>
    %23 = math.exp %22 : vector<2x8x8xf32>
    %cst_11 = arith.constant dense<0.000000e+00> : vector<2x8xf32>
    %24 = vector.multi_reduction <add>, %23, %cst_11 [2] : vector<2x8x8xf32> to vector<2x8xf32>
    %25 = vector.shape_cast %24 : vector<2x8xf32> to vector<2x8x1xf32>
    %26 = tpu.reciprocal %25 {approx = true} : vector<2x8x1xf32> -> vector<2x8x1xf32>
    %27 = vector.broadcast %26 : vector<2x8x1xf32> to vector<2x8x8xf32>
    %28 = arith.mulf %23, %27 : vector<2x8x8xf32>
    "tpu.trace_start"() <{level = 10 : i32, message = "bij,bjd->bid"}> : () -> ()
    %cst_12 = arith.constant dense<0.000000e+00> : vector<2x8x4xf32>
    %29 = tpu.matmul %28, %15, %cst_12 {dimension_numbers = #tpu.dot_dimension_numbers<[2], [1], [1], [2], [0, 0, 0, 1, 1, 2], [0], [0]>} : vector<2x8x8xf32>, vector<2x8x4xf32>, vector<2x8x4xf32> -> vector<2x8x4xf32>
    "tpu.trace_stop"() : () -> ()
    %30 = vector.extract_strided_slice %12 {offsets = [0, 0, 4], sizes = [2, 8, 4], strides = [1, 1, 1]} : vector<2x8x96xf32> to vector<2x8x4xf32>
    %31 = vector.extract_strided_slice %12 {offsets = [0, 0, 36], sizes = [2, 8, 4], strides = [1, 1, 1]} : vector<2x8x96xf32> to vector<2x8x4xf32>
    %32 = vector.extract_strided_slice %12 {offsets = [0, 0, 68], sizes = [2, 8, 4], strides = [1, 1, 1]} : vector<2x8x96xf32> to vector<2x8x4xf32>
    "tpu.trace_start"() <{level = 10 : i32, message = "bid,bjd->bij"}> : () -> ()
    %cst_13 = arith.constant dense<0.000000e+00> : vector<2x8x8xf32>
    %33 = tpu.matmul %30, %31, %cst_13 {dimension_numbers = #tpu.dot_dimension_numbers<[2], [2], [1], [1], [0, 0, 0, 1, 1, 1], [0], [0]>} : vector<2x8x4xf32>, vector<2x8x4xf32>, vector<2x8x8xf32> -> vector<2x8x8xf32>
    "tpu.trace_stop"() : () -> ()
    %cst_14 = arith.constant 5.000000e-01 : f32
    %34 = vector.broadcast %cst_14 : f32 to vector<2x8x8xf32>
    %35 = arith.mulf %33, %34 : vector<2x8x8xf32>
    %cst_15 = arith.constant dense<0xFF800000> : vector<2x8xf32>
    %36 = vector.multi_reduction <maximumf>, %35, %cst_15 [2] : vector<2x8x8xf32> to vector<2x8xf32>
    %37 = vector.shape_cast %36 : vector<2x8xf32> to vector<2x8x1xf32>
    %38 = vector.broadcast %37 : vector<2x8x1xf32> to vector<2x8x8xf32>
    %39 = arith.subf %35, %38 : vector<2x8x8xf32>
    %40 = math.exp %39 : vector<2x8x8xf32>
    %cst_16 = arith.constant dense<0.000000e+00> : vector<2x8xf32>
    %41 = vector.multi_reduction <add>, %40, %cst_16 [2] : vector<2x8x8xf32> to vector<2x8xf32>
    %42 = vector.shape_cast %41 : vector<2x8xf32> to vector<2x8x1xf32>
    %43 = tpu.reciprocal %42 {approx = true} : vector<2x8x1xf32> -> vector<2x8x1xf32>
    %44 = vector.broadcast %43 : vector<2x8x1xf32> to vector<2x8x8xf32>
    %45 = arith.mulf %40, %44 : vector<2x8x8xf32>
    "tpu.trace_start"() <{level = 10 : i32, message = "bij,bjd->bid"}> : () -> ()
    %cst_17 = arith.constant dense<0.000000e+00> : vector<2x8x4xf32>
    %46 = tpu.matmul %45, %32, %cst_17 {dimension_numbers = #tpu.dot_dimension_numbers<[2], [1], [1], [2], [0, 0, 0, 1, 1, 2], [0], [0]>} : vector<2x8x8xf32>, vector<2x8x4xf32>, vector<2x8x4xf32> -> vector<2x8x4xf32>
    "tpu.trace_stop"() : () -> ()
    %47 = vector.extract_strided_slice %12 {offsets = [0, 0, 8], sizes = [2, 8, 4], strides = [1, 1, 1]} : vector<2x8x96xf32> to vector<2x8x4xf32>
    %48 = vector.extract_strided_slice %12 {offsets = [0, 0, 40], sizes = [2, 8, 4], strides = [1, 1, 1]} : vector<2x8x96xf32> to vector<2x8x4xf32>
    %49 = vector.extract_strided_slice %12 {offsets = [0, 0, 72], sizes = [2, 8, 4], strides = [1, 1, 1]} : vector<2x8x96xf32> to vector<2x8x4xf32>
    "tpu.trace_start"() <{level = 10 : i32, message = "bid,bjd->bij"}> : () -> ()
    %cst_18 = arith.constant dense<0.000000e+00> : vector<2x8x8xf32>
    %50 = tpu.matmul %47, %48, %cst_18 {dimension_numbers = #tpu.dot_dimension_numbers<[2], [2], [1], [1], [0, 0, 0, 1, 1, 1], [0], [0]>} : vector<2x8x4xf32>, vector<2x8x4xf32>, vector<2x8x8xf32> -> vector<2x8x8xf32>
    "tpu.trace_stop"() : () -> ()
    %cst_19 = arith.constant 5.000000e-01 : f32
    %51 = vector.broadcast %cst_19 : f32 to vector<2x8x8xf32>
    %52 = arith.mulf %50, %51 : vector<2x8x8xf32>
    %cst_20 = arith.constant dense<0xFF800000> : vector<2x8xf32>
    %53 = vector.multi_reduction <maximumf>, %52, %cst_20 [2] : vector<2x8x8xf32> to vector<2x8xf32>
    %54 = vector.shape_cast %53 : vector<2x8xf32> to vector<2x8x1xf32>
    %55 = vector.broadcast %54 : vector<2x8x1xf32> to vector<2x8x8xf32>
    %56 = arith.subf %52, %55 : vector<2x8x8xf32>
    %57 = math.exp %56 : vector<2x8x8xf32>
    %cst_21 = arith.constant dense<0.000000e+00> : vector<2x8xf32>
    %58 = vector.multi_reduction <add>, %57, %cst_21 [2] : vector<2x8x8xf32> to vector<2x8xf32>
    %59 = vector.shape_cast %58 : vector<2x8xf32> to vector<2x8x1xf32>
    %60 = tpu.reciprocal %59 {approx = true} : vector<2x8x1xf32> -> vector<2x8x1xf32>
    %61 = vector.broadcast %60 : vector<2x8x1xf32> to vector<2x8x8xf32>
    %62 = arith.mulf %57, %61 : vector<2x8x8xf32>
    "tpu.trace_start"() <{level = 10 : i32, message = "bij,bjd->bid"}> : () -> ()
    %cst_22 = arith.constant dense<0.000000e+00> : vector<2x8x4xf32>
    %63 = tpu.matmul %62, %49, %cst_22 {dimension_numbers = #tpu.dot_dimension_numbers<[2], [1], [1], [2], [0, 0, 0, 1, 1, 2], [0], [0]>} : vector<2x8x8xf32>, vector<2x8x4xf32>, vector<2x8x4xf32> -> vector<2x8x4xf32>
    "tpu.trace_stop"() : () -> ()
    %64 = vector.extract_strided_slice %12 {offsets = [0, 0, 12], sizes = [2, 8, 4], strides = [1, 1, 1]} : vector<2x8x96xf32> to vector<2x8x4xf32>
    %65 = vector.extract_strided_slice %12 {offsets = [0, 0, 44], sizes = [2, 8, 4], strides = [1, 1, 1]} : vector<2x8x96xf32> to vector<2x8x4xf32>
    %66 = vector.extract_strided_slice %12 {offsets = [0, 0, 76], sizes = [2, 8, 4], strides = [1, 1, 1]} : vector<2x8x96xf32> to vector<2x8x4xf32>
    "tpu.trace_start"() <{level = 10 : i32, message = "bid,bjd->bij"}> : () -> ()
    %cst_23 = arith.constant dense<0.000000e+00> : vector<2x8x8xf32>
    %67 = tpu.matmul %64, %65, %cst_23 {dimension_numbers = #tpu.dot_dimension_numbers<[2], [2], [1], [1], [0, 0, 0, 1, 1, 1], [0], [0]>} : vector<2x8x4xf32>, vector<2x8x4xf32>, vector<2x8x8xf32> -> vector<2x8x8xf32>
    "tpu.trace_stop"() : () -> ()
    %cst_24 = arith.constant 5.000000e-01 : f32
    %68 = vector.broadcast %cst_24 : f32 to vector<2x8x8xf32>
    %69 = arith.mulf %67, %68 : vector<2x8x8xf32>
    %cst_25 = arith.constant dense<0xFF800000> : vector<2x8xf32>
    %70 = vector.multi_reduction <maximumf>, %69, %cst_25 [2] : vector<2x8x8xf32> to vector<2x8xf32>
    %71 = vector.shape_cast %70 : vector<2x8xf32> to vector<2x8x1xf32>
    %72 = vector.broadcast %71 : vector<2x8x1xf32> to vector<2x8x8xf32>
    %73 = arith.subf %69, %72 : vector<2x8x8xf32>
    %74 = math.exp %73 : vector<2x8x8xf32>
    %cst_26 = arith.constant dense<0.000000e+00> : vector<2x8xf32>
    %75 = vector.multi_reduction <add>, %74, %cst_26 [2] : vector<2x8x8xf32> to vector<2x8xf32>
    %76 = vector.shape_cast %75 : vector<2x8xf32> to vector<2x8x1xf32>
    %77 = tpu.reciprocal %76 {approx = true} : vector<2x8x1xf32> -> vector<2x8x1xf32>
    %78 = vector.broadcast %77 : vector<2x8x1xf32> to vector<2x8x8xf32>
    %79 = arith.mulf %74, %78 : vector<2x8x8xf32>
    "tpu.trace_start"() <{level = 10 : i32, message = "bij,bjd->bid"}> : () -> ()
    %cst_27 = arith.constant dense<0.000000e+00> : vector<2x8x4xf32>
    %80 = tpu.matmul %79, %66, %cst_27 {dimension_numbers = #tpu.dot_dimension_numbers<[2], [1], [1], [2], [0, 0, 0, 1, 1, 2], [0], [0]>} : vector<2x8x8xf32>, vector<2x8x4xf32>, vector<2x8x4xf32> -> vector<2x8x4xf32>
    "tpu.trace_stop"() : () -> ()
    %81 = vector.extract_strided_slice %12 {offsets = [0, 0, 16], sizes = [2, 8, 4], strides = [1, 1, 1]} : vector<2x8x96xf32> to vector<2x8x4xf32>
    %82 = vector.extract_strided_slice %12 {offsets = [0, 0, 48], sizes = [2, 8, 4], strides = [1, 1, 1]} : vector<2x8x96xf32> to vector<2x8x4xf32>
    %83 = vector.extract_strided_slice %12 {offsets = [0, 0, 80], sizes = [2, 8, 4], strides = [1, 1, 1]} : vector<2x8x96xf32> to vector<2x8x4xf32>
    "tpu.trace_start"() <{level = 10 : i32, message = "bid,bjd->bij"}> : () -> ()
    %cst_28 = arith.constant dense<0.000000e+00> : vector<2x8x8xf32>
    %84 = tpu.matmul %81, %82, %cst_28 {dimension_numbers = #tpu.dot_dimension_numbers<[2], [2], [1], [1], [0, 0, 0, 1, 1, 1], [0], [0]>} : vector<2x8x4xf32>, vector<2x8x4xf32>, vector<2x8x8xf32> -> vector<2x8x8xf32>
    "tpu.trace_stop"() : () -> ()
    %cst_29 = arith.constant 5.000000e-01 : f32
    %85 = vector.broadcast %cst_29 : f32 to vector<2x8x8xf32>
    %86 = arith.mulf %84, %85 : vector<2x8x8xf32>
    %cst_30 = arith.constant dense<0xFF800000> : vector<2x8xf32>
    %87 = vector.multi_reduction <maximumf>, %86, %cst_30 [2] : vector<2x8x8xf32> to vector<2x8xf32>
    %88 = vector.shape_cast %87 : vector<2x8xf32> to vector<2x8x1xf32>
    %89 = vector.broadcast %88 : vector<2x8x1xf32> to vector<2x8x8xf32>
    %90 = arith.subf %86, %89 : vector<2x8x8xf32>
    %91 = math.exp %90 : vector<2x8x8xf32>
    %cst_31 = arith.constant dense<0.000000e+00> : vector<2x8xf32>
    %92 = vector.multi_reduction <add>, %91, %cst_31 [2] : vector<2x8x8xf32> to vector<2x8xf32>
    %93 = vector.shape_cast %92 : vector<2x8xf32> to vector<2x8x1xf32>
    %94 = tpu.reciprocal %93 {approx = true} : vector<2x8x1xf32> -> vector<2x8x1xf32>
    %95 = vector.broadcast %94 : vector<2x8x1xf32> to vector<2x8x8xf32>
    %96 = arith.mulf %91, %95 : vector<2x8x8xf32>
    "tpu.trace_start"() <{level = 10 : i32, message = "bij,bjd->bid"}> : () -> ()
    %cst_32 = arith.constant dense<0.000000e+00> : vector<2x8x4xf32>
    %97 = tpu.matmul %96, %83, %cst_32 {dimension_numbers = #tpu.dot_dimension_numbers<[2], [1], [1], [2], [0, 0, 0, 1, 1, 2], [0], [0]>} : vector<2x8x8xf32>, vector<2x8x4xf32>, vector<2x8x4xf32> -> vector<2x8x4xf32>
    "tpu.trace_stop"() : () -> ()
    %98 = vector.extract_strided_slice %12 {offsets = [0, 0, 20], sizes = [2, 8, 4], strides = [1, 1, 1]} : vector<2x8x96xf32> to vector<2x8x4xf32>
    %99 = vector.extract_strided_slice %12 {offsets = [0, 0, 52], sizes = [2, 8, 4], strides = [1, 1, 1]} : vector<2x8x96xf32> to vector<2x8x4xf32>
    %100 = vector.extract_strided_slice %12 {offsets = [0, 0, 84], sizes = [2, 8, 4], strides = [1, 1, 1]} : vector<2x8x96xf32> to vector<2x8x4xf32>
    "tpu.trace_start"() <{level = 10 : i32, message = "bid,bjd->bij"}> : () -> ()
    %cst_33 = arith.constant dense<0.000000e+00> : vector<2x8x8xf32>
    %101 = tpu.matmul %98, %99, %cst_33 {dimension_numbers = #tpu.dot_dimension_numbers<[2], [2], [1], [1], [0, 0, 0, 1, 1, 1], [0], [0]>} : vector<2x8x4xf32>, vector<2x8x4xf32>, vector<2x8x8xf32> -> vector<2x8x8xf32>
    "tpu.trace_stop"() : () -> ()
    %cst_34 = arith.constant 5.000000e-01 : f32
    %102 = vector.broadcast %cst_34 : f32 to vector<2x8x8xf32>
    %103 = arith.mulf %101, %102 : vector<2x8x8xf32>
    %cst_35 = arith.constant dense<0xFF800000> : vector<2x8xf32>
    %104 = vector.multi_reduction <maximumf>, %103, %cst_35 [2] : vector<2x8x8xf32> to vector<2x8xf32>
    %105 = vector.shape_cast %104 : vector<2x8xf32> to vector<2x8x1xf32>
    %106 = vector.broadcast %105 : vector<2x8x1xf32> to vector<2x8x8xf32>
    %107 = arith.subf %103, %106 : vector<2x8x8xf32>
    %108 = math.exp %107 : vector<2x8x8xf32>
    %cst_36 = arith.constant dense<0.000000e+00> : vector<2x8xf32>
    %109 = vector.multi_reduction <add>, %108, %cst_36 [2] : vector<2x8x8xf32> to vector<2x8xf32>
    %110 = vector.shape_cast %109 : vector<2x8xf32> to vector<2x8x1xf32>
    %111 = tpu.reciprocal %110 {approx = true} : vector<2x8x1xf32> -> vector<2x8x1xf32>
    %112 = vector.broadcast %111 : vector<2x8x1xf32> to vector<2x8x8xf32>
    %113 = arith.mulf %108, %112 : vector<2x8x8xf32>
    "tpu.trace_start"() <{level = 10 : i32, message = "bij,bjd->bid"}> : () -> ()
    %cst_37 = arith.constant dense<0.000000e+00> : vector<2x8x4xf32>
    %114 = tpu.matmul %113, %100, %cst_37 {dimension_numbers = #tpu.dot_dimension_numbers<[2], [1], [1], [2], [0, 0, 0, 1, 1, 2], [0], [0]>} : vector<2x8x8xf32>, vector<2x8x4xf32>, vector<2x8x4xf32> -> vector<2x8x4xf32>
    "tpu.trace_stop"() : () -> ()
    %115 = vector.extract_strided_slice %12 {offsets = [0, 0, 24], sizes = [2, 8, 4], strides = [1, 1, 1]} : vector<2x8x96xf32> to vector<2x8x4xf32>
    %116 = vector.extract_strided_slice %12 {offsets = [0, 0, 56], sizes = [2, 8, 4], strides = [1, 1, 1]} : vector<2x8x96xf32> to vector<2x8x4xf32>
    %117 = vector.extract_strided_slice %12 {offsets = [0, 0, 88], sizes = [2, 8, 4], strides = [1, 1, 1]} : vector<2x8x96xf32> to vector<2x8x4xf32>
    "tpu.trace_start"() <{level = 10 : i32, message = "bid,bjd->bij"}> : () -> ()
    %cst_38 = arith.constant dense<0.000000e+00> : vector<2x8x8xf32>
    %118 = tpu.matmul %115, %116, %cst_38 {dimension_numbers = #tpu.dot_dimension_numbers<[2], [2], [1], [1], [0, 0, 0, 1, 1, 1], [0], [0]>} : vector<2x8x4xf32>, vector<2x8x4xf32>, vector<2x8x8xf32> -> vector<2x8x8xf32>
    "tpu.trace_stop"() : () -> ()
    %cst_39 = arith.constant 5.000000e-01 : f32
    %119 = vector.broadcast %cst_39 : f32 to vector<2x8x8xf32>
    %120 = arith.mulf %118, %119 : vector<2x8x8xf32>
    %cst_40 = arith.constant dense<0xFF800000> : vector<2x8xf32>
    %121 = vector.multi_reduction <maximumf>, %120, %cst_40 [2] : vector<2x8x8xf32> to vector<2x8xf32>
    %122 = vector.shape_cast %121 : vector<2x8xf32> to vector<2x8x1xf32>
    %123 = vector.broadcast %122 : vector<2x8x1xf32> to vector<2x8x8xf32>
    %124 = arith.subf %120, %123 : vector<2x8x8xf32>
    %125 = math.exp %124 : vector<2x8x8xf32>
    %cst_41 = arith.constant dense<0.000000e+00> : vector<2x8xf32>
    %126 = vector.multi_reduction <add>, %125, %cst_41 [2] : vector<2x8x8xf32> to vector<2x8xf32>
    %127 = vector.shape_cast %126 : vector<2x8xf32> to vector<2x8x1xf32>
    %128 = tpu.reciprocal %127 {approx = true} : vector<2x8x1xf32> -> vector<2x8x1xf32>
    %129 = vector.broadcast %128 : vector<2x8x1xf32> to vector<2x8x8xf32>
    %130 = arith.mulf %125, %129 : vector<2x8x8xf32>
    "tpu.trace_start"() <{level = 10 : i32, message = "bij,bjd->bid"}> : () -> ()
    %cst_42 = arith.constant dense<0.000000e+00> : vector<2x8x4xf32>
    %131 = tpu.matmul %130, %117, %cst_42 {dimension_numbers = #tpu.dot_dimension_numbers<[2], [1], [1], [2], [0, 0, 0, 1, 1, 2], [0], [0]>} : vector<2x8x8xf32>, vector<2x8x4xf32>, vector<2x8x4xf32> -> vector<2x8x4xf32>
    "tpu.trace_stop"() : () -> ()
    %132 = vector.extract_strided_slice %12 {offsets = [0, 0, 28], sizes = [2, 8, 4], strides = [1, 1, 1]} : vector<2x8x96xf32> to vector<2x8x4xf32>
    %133 = vector.extract_strided_slice %12 {offsets = [0, 0, 60], sizes = [2, 8, 4], strides = [1, 1, 1]} : vector<2x8x96xf32> to vector<2x8x4xf32>
    %134 = vector.extract_strided_slice %12 {offsets = [0, 0, 92], sizes = [2, 8, 4], strides = [1, 1, 1]} : vector<2x8x96xf32> to vector<2x8x4xf32>
    "tpu.trace_start"() <{level = 10 : i32, message = "bid,bjd->bij"}> : () -> ()
    %cst_43 = arith.constant dense<0.000000e+00> : vector<2x8x8xf32>
    %135 = tpu.matmul %132, %133, %cst_43 {dimension_numbers = #tpu.dot_dimension_numbers<[2], [2], [1], [1], [0, 0, 0, 1, 1, 1], [0], [0]>} : vector<2x8x4xf32>, vector<2x8x4xf32>, vector<2x8x8xf32> -> vector<2x8x8xf32>
    "tpu.trace_stop"() : () -> ()
    %cst_44 = arith.constant 5.000000e-01 : f32
    %136 = vector.broadcast %cst_44 : f32 to vector<2x8x8xf32>
    %137 = arith.mulf %135, %136 : vector<2x8x8xf32>
    %cst_45 = arith.constant dense<0xFF800000> : vector<2x8xf32>
    %138 = vector.multi_reduction <maximumf>, %137, %cst_45 [2] : vector<2x8x8xf32> to vector<2x8xf32>
    %139 = vector.shape_cast %138 : vector<2x8xf32> to vector<2x8x1xf32>
    %140 = vector.broadcast %139 : vector<2x8x1xf32> to vector<2x8x8xf32>
    %141 = arith.subf %137, %140 : vector<2x8x8xf32>
    %142 = math.exp %141 : vector<2x8x8xf32>
    %cst_46 = arith.constant dense<0.000000e+00> : vector<2x8xf32>
    %143 = vector.multi_reduction <add>, %142, %cst_46 [2] : vector<2x8x8xf32> to vector<2x8xf32>
    %144 = vector.shape_cast %143 : vector<2x8xf32> to vector<2x8x1xf32>
    %145 = tpu.reciprocal %144 {approx = true} : vector<2x8x1xf32> -> vector<2x8x1xf32>
    %146 = vector.broadcast %145 : vector<2x8x1xf32> to vector<2x8x8xf32>
    %147 = arith.mulf %142, %146 : vector<2x8x8xf32>
    "tpu.trace_start"() <{level = 10 : i32, message = "bij,bjd->bid"}> : () -> ()
    %cst_47 = arith.constant dense<0.000000e+00> : vector<2x8x4xf32>
    %148 = tpu.matmul %147, %134, %cst_47 {dimension_numbers = #tpu.dot_dimension_numbers<[2], [1], [1], [2], [0, 0, 0, 1, 1, 2], [0], [0]>} : vector<2x8x8xf32>, vector<2x8x4xf32>, vector<2x8x4xf32> -> vector<2x8x4xf32>
    "tpu.trace_stop"() : () -> ()
    %149 = tpu.concatenate %29, %46, %63, %80, %97, %114, %131, %148 in 2 : vector<2x8x4xf32>, vector<2x8x4xf32>, vector<2x8x4xf32>, vector<2x8x4xf32>, vector<2x8x4xf32>, vector<2x8x4xf32>, vector<2x8x4xf32>, vector<2x8x4xf32> -> vector<2x8x32xf32>
    %150 = vector.shape_cast %149 : vector<2x8x32xf32> to vector<16x32xf32>
    %151 = arith.truncf %150 : vector<16x32xf32> to vector<16x32xbf16>
    %c0_48 = arith.constant 0 : index
    %c0_49 = arith.constant 0 : index
    %c0_50 = arith.constant 0 : index
    %152 = vector.load %arg4[%c0_48, %c0_49, %c0_50] : memref<1x32x32xbf16, #tpu.memory_space<vmem>>, vector<1x32x32xbf16>
    %153 = vector.shape_cast %152 : vector<1x32x32xbf16> to vector<32x32xbf16>
    %cst_51 = arith.constant dense<0.000000e+00> : vector<16x32xf32>
    %154 = tpu.matmul %151, %153, %cst_51 {dimension_numbers = #tpu.dot_dimension_numbers<[1], [0], [0], [1], [0, 0, 1, 1], [], []>} : vector<16x32xbf16>, vector<32x32xbf16>, vector<16x32xf32> -> vector<16x32xf32>
    %c0_52 = arith.constant 0 : index
    %c0_53 = arith.constant 0 : index
    %c0_54 = arith.constant 0 : index
    %155 = vector.load %arg5[%c0_52, %c0_53, %c0_54] : memref<1x8x32xf32, #tpu.memory_space<vmem>>, vector<1x1x32xf32>
    %156 = vector.shape_cast %155 : vector<1x1x32xf32> to vector<1x32xf32>
    %157 = vector.broadcast %156 : vector<1x32xf32> to vector<16x32xf32>
    %158 = arith.addf %154, %157 : vector<16x32xf32>
    %159 = arith.addf %3, %158 : vector<16x32xf32>
    %c0_55 = arith.constant 0 : index
    %c1 = arith.constant 1 : index
    %c0_56 = arith.constant 0 : index
    %160 = vector.load %arg5[%c0_55, %c1, %c0_56] : memref<1x8x32xf32, #tpu.memory_space<vmem>>, vector<1x1x32xf32>
    %161 = vector.shape_cast %160 : vector<1x1x32xf32> to vector<1x32xf32>
    %c0_57 = arith.constant 0 : index
    %c2 = arith.constant 2 : index
    %c0_58 = arith.constant 0 : index
    %162 = vector.load %arg5[%c0_57, %c2, %c0_58] : memref<1x8x32xf32, #tpu.memory_space<vmem>>, vector<1x1x32xf32>
    %163 = vector.shape_cast %162 : vector<1x1x32xf32> to vector<1x32xf32>
    %cst_59 = arith.constant dense<0.000000e+00> : vector<16xf32>
    %164 = vector.multi_reduction <add>, %159, %cst_59 [1] : vector<16x32xf32> to vector<16xf32>
    %165 = vector.shape_cast %164 : vector<16xf32> to vector<16x1xf32>
    %cst_60 = arith.constant 3.200000e+01 : f32
    %166 = vector.broadcast %cst_60 : f32 to vector<16x1xf32>
    %167 = arith.divf %165, %166 : vector<16x1xf32>
    %168 = vector.broadcast %167 : vector<16x1xf32> to vector<16x32xf32>
    %169 = arith.subf %159, %168 : vector<16x32xf32>
    %170 = arith.mulf %169, %169 : vector<16x32xf32>
    %cst_61 = arith.constant dense<0.000000e+00> : vector<16xf32>
    %171 = vector.multi_reduction <add>, %170, %cst_61 [1] : vector<16x32xf32> to vector<16xf32>
    %172 = vector.shape_cast %171 : vector<16xf32> to vector<16x1xf32>
    %cst_62 = arith.constant 3.200000e+01 : f32
    %173 = vector.broadcast %cst_62 : f32 to vector<16x1xf32>
    %174 = arith.divf %172, %173 : vector<16x1xf32>
    %cst_63 = arith.constant 9.99999974E-6 : f32
    %175 = vector.broadcast %cst_63 : f32 to vector<16x1xf32>
    %176 = arith.addf %174, %175 : vector<16x1xf32>
    %177 = math.rsqrt %176 : vector<16x1xf32>
    %178 = vector.broadcast %177 : vector<16x1xf32> to vector<16x32xf32>
    %179 = arith.mulf %169, %178 : vector<16x32xf32>
    %180 = vector.broadcast %161 : vector<1x32xf32> to vector<16x32xf32>
    %181 = arith.mulf %179, %180 : vector<16x32xf32>
    %182 = vector.broadcast %163 : vector<1x32xf32> to vector<16x32xf32>
    %183 = arith.addf %181, %182 : vector<16x32xf32>
    %184 = arith.truncf %183 : vector<16x32xf32> to vector<16x32xbf16>
    %c0_64 = arith.constant 0 : index
    %c0_65 = arith.constant 0 : index
    %c0_66 = arith.constant 0 : index
    %185 = vector.load %arg6[%c0_64, %c0_65, %c0_66] : memref<1x32x2048xbf16, #tpu.memory_space<vmem>>, vector<1x32x2048xbf16>
    %186 = vector.shape_cast %185 : vector<1x32x2048xbf16> to vector<32x2048xbf16>
    %cst_67 = arith.constant dense<0.000000e+00> : vector<16x2048xf32>
    %187 = tpu.matmul %184, %186, %cst_67 {dimension_numbers = #tpu.dot_dimension_numbers<[1], [0], [0], [1], [0, 0, 1, 1], [], []>} : vector<16x32xbf16>, vector<32x2048xbf16>, vector<16x2048xf32> -> vector<16x2048xf32>
    %c0_68 = arith.constant 0 : index
    %c0_69 = arith.constant 0 : index
    %c0_70 = arith.constant 0 : index
    %188 = vector.load %arg7[%c0_68, %c0_69, %c0_70] : memref<1x1x2048xf32, #tpu.memory_space<vmem>>, vector<1x1x2048xf32>
    %189 = vector.shape_cast %188 : vector<1x1x2048xf32> to vector<1x2048xf32>
    %190 = vector.broadcast %189 : vector<1x2048xf32> to vector<16x2048xf32>
    %191 = arith.addf %187, %190 : vector<16x2048xf32>
    %cst_71 = arith.constant 0.000000e+00 : f32
    %192 = vector.broadcast %cst_71 : f32 to vector<16x2048xf32>
    %193 = arith.maximumf %191, %192 : vector<16x2048xf32>
    %194 = arith.truncf %193 : vector<16x2048xf32> to vector<16x2048xbf16>
    %c0_72 = arith.constant 0 : index
    %c0_73 = arith.constant 0 : index
    %c0_74 = arith.constant 0 : index
    %195 = vector.load %arg8[%c0_72, %c0_73, %c0_74] : memref<1x2048x32xbf16, #tpu.memory_space<vmem>>, vector<1x2048x32xbf16>
    %196 = vector.shape_cast %195 : vector<1x2048x32xbf16> to vector<2048x32xbf16>
    %cst_75 = arith.constant dense<0.000000e+00> : vector<16x32xf32>
    %197 = tpu.matmul %194, %196, %cst_75 {dimension_numbers = #tpu.dot_dimension_numbers<[1], [0], [0], [1], [0, 0, 1, 1], [], []>} : vector<16x2048xbf16>, vector<2048x32xbf16>, vector<16x32xf32> -> vector<16x32xf32>
    %c0_76 = arith.constant 0 : index
    %c5 = arith.constant 5 : index
    %c0_77 = arith.constant 0 : index
    %198 = vector.load %arg5[%c0_76, %c5, %c0_77] : memref<1x8x32xf32, #tpu.memory_space<vmem>>, vector<1x1x32xf32>
    %199 = vector.shape_cast %198 : vector<1x1x32xf32> to vector<1x32xf32>
    %200 = vector.broadcast %199 : vector<1x32xf32> to vector<16x32xf32>
    %201 = arith.addf %197, %200 : vector<16x32xf32>
    %202 = arith.addf %183, %201 : vector<16x32xf32>
    %c0_78 = arith.constant 0 : index
    %c3 = arith.constant 3 : index
    %c0_79 = arith.constant 0 : index
    %203 = vector.load %arg5[%c0_78, %c3, %c0_79] : memref<1x8x32xf32, #tpu.memory_space<vmem>>, vector<1x1x32xf32>
    %204 = vector.shape_cast %203 : vector<1x1x32xf32> to vector<1x32xf32>
    %c0_80 = arith.constant 0 : index
    %c4 = arith.constant 4 : index
    %c0_81 = arith.constant 0 : index
    %205 = vector.load %arg5[%c0_80, %c4, %c0_81] : memref<1x8x32xf32, #tpu.memory_space<vmem>>, vector<1x1x32xf32>
    %206 = vector.shape_cast %205 : vector<1x1x32xf32> to vector<1x32xf32>
    %cst_82 = arith.constant dense<0.000000e+00> : vector<16xf32>
    %207 = vector.multi_reduction <add>, %202, %cst_82 [1] : vector<16x32xf32> to vector<16xf32>
    %208 = vector.shape_cast %207 : vector<16xf32> to vector<16x1xf32>
    %cst_83 = arith.constant 3.200000e+01 : f32
    %209 = vector.broadcast %cst_83 : f32 to vector<16x1xf32>
    %210 = arith.divf %208, %209 : vector<16x1xf32>
    %211 = vector.broadcast %210 : vector<16x1xf32> to vector<16x32xf32>
    %212 = arith.subf %202, %211 : vector<16x32xf32>
    %213 = arith.mulf %212, %212 : vector<16x32xf32>
    %cst_84 = arith.constant dense<0.000000e+00> : vector<16xf32>
    %214 = vector.multi_reduction <add>, %213, %cst_84 [1] : vector<16x32xf32> to vector<16xf32>
    %215 = vector.shape_cast %214 : vector<16xf32> to vector<16x1xf32>
    %cst_85 = arith.constant 3.200000e+01 : f32
    %216 = vector.broadcast %cst_85 : f32 to vector<16x1xf32>
    %217 = arith.divf %215, %216 : vector<16x1xf32>
    %cst_86 = arith.constant 9.99999974E-6 : f32
    %218 = vector.broadcast %cst_86 : f32 to vector<16x1xf32>
    %219 = arith.addf %217, %218 : vector<16x1xf32>
    %220 = math.rsqrt %219 : vector<16x1xf32>
    %221 = vector.broadcast %220 : vector<16x1xf32> to vector<16x32xf32>
    %222 = arith.mulf %212, %221 : vector<16x32xf32>
    %223 = vector.broadcast %204 : vector<1x32xf32> to vector<16x32xf32>
    %224 = arith.mulf %222, %223 : vector<16x32xf32>
    %225 = vector.broadcast %206 : vector<1x32xf32> to vector<16x32xf32>
    %226 = arith.addf %224, %225 : vector<16x32xf32>
    %c0_87 = arith.constant 0 : index
    %c0_88 = arith.constant 0 : index
    %227 = vector.load %arg9[%c0_87, %c0_88] : memref<16x32xf32, #tpu.memory_space<vmem>>, vector<16x32xf32>
    tpu.vector_store %arg9[%c0_87, %c0_88], %226 {strides = array<i32>} : memref<16x32xf32, #tpu.memory_space<vmem>>, vector<16x32xf32>,
    return
  }
  func.func @transform_0(%arg0: i32) -> (i32, i32) {
    %c0_i32 = arith.constant 0 : i32
    %c0_i32_0 = arith.constant 0 : i32
    %c0_i32_1 = arith.constant 0 : i32
    return %c0_i32, %c0_i32_0 : i32, i32
  }
  func.func @transform_1(%arg0: i32) -> (i32, i32, i32) {
    %c0_i32 = arith.constant 0 : i32
    %c0_i32_0 = arith.constant 0 : i32
    %c0_i32_1 = arith.constant 0 : i32
    return %arg0, %c0_i32, %c0_i32_0 : i32, i32, i32
  }
  func.func @transform_2(%arg0: i32) -> (i32, i32, i32) {
    %c0_i32 = arith.constant 0 : i32
    %c0_i32_0 = arith.constant 0 : i32
    %c0_i32_1 = arith.constant 0 : i32
    return %arg0, %c0_i32, %c0_i32_0 : i32, i32, i32
  }
  func.func @transform_3(%arg0: i32) -> (i32, i32, i32) {
    %c0_i32 = arith.constant 0 : i32
    %c0_i32_0 = arith.constant 0 : i32
    %c0_i32_1 = arith.constant 0 : i32
    return %arg0, %c0_i32, %c0_i32_0 : i32, i32, i32
  }
  func.func @transform_4(%arg0: i32) -> (i32, i32, i32) {
    %c0_i32 = arith.constant 0 : i32
    %c0_i32_0 = arith.constant 0 : i32
    %c0_i32_1 = arith.constant 0 : i32
    return %arg0, %c0_i32, %c0_i32_0 : i32, i32, i32
  }
  func.func @transform_5(%arg0: i32) -> (i32, i32, i32) {
    %c0_i32 = arith.constant 0 : i32
    %c0_i32_0 = arith.constant 0 : i32
    %c0_i32_1 = arith.constant 0 : i32
    return %arg0, %c0_i32, %c0_i32_0 : i32, i32, i32
  }
  func.func @transform_6(%arg0: i32) -> (i32, i32, i32) {
    %c0_i32 = arith.constant 0 : i32
    %c0_i32_0 = arith.constant 0 : i32
    %c0_i32_1 = arith.constant 0 : i32
    return %arg0, %c0_i32, %c0_i32_0 : i32, i32, i32
  }
  func.func @transform_7(%arg0: i32) -> (i32, i32, i32) {
    %c0_i32 = arith.constant 0 : i32
    %c0_i32_0 = arith.constant 0 : i32
    %c0_i32_1 = arith.constant 0 : i32
    return %arg0, %c0_i32, %c0_i32_0 : i32, i32, i32
  }
  func.func @transform_8(%arg0: i32) -> (i32, i32) {
    %c0_i32 = arith.constant 0 : i32
    %c0_i32_0 = arith.constant 0 : i32
    %c0_i32_1 = arith.constant 0 : i32
    return %c0_i32, %c0_i32_0 : i32, i32
  }
}

</mosaic_0001>

<bundles_post_ra>
// kernel: encoder_forward.1
= control target key start
LH: loop header
LB: loop body
LE: loop exit
PB: predicated region body
PF: predicated region fallthrough
CT: control target
= control target key end

     0   :  { %s6530_s27 = smov 0   ;;  %s7195_s0 = inlined_call_operand.vmem [shape: f32[16,32], index: 0, kind: input, shape index: {}, may-alias: {0,8}]   ;;  %s7196_s1 = inlined_call_operand.vmem [shape: bf16[2,32,96], index: 1, kind: input, shape index: {}]   ;;  %s7197_s2 = inlined_call_operand.vmem [shape: f32[2,1,96], index: 2, kind: input, shape index: {}]   ;;  %s7198_s3 = inlined_call_operand.vmem [shape: bf16[2,32,32], index: 3, kind: input, shape index: {}]   ;;  %s7199_s4 = inlined_call_operand.vmem [shape: f32[2,8,32], index: 4, kind: input, shape index: {}]   ;;  %s7200_s5 = inlined_call_operand.vmem [shape: bf16[2,32,2048], index: 5, kind: input, shape index: {}]   ;;  %s7201_s6 = inlined_call_operand.vmem [shape: f32[2,1,2048], index: 6, kind: input, shape index: {}]   ;;  %s7202_s7 = inlined_call_operand.vmem [shape: bf16[2,2048,32], index: 7, kind: input, shape index: {}]   ;;  %s7203_s8 = inlined_call_operand.vmem [shape: f32[16,32], index: 8, kind: output, shape index: {}, may-alias: {0,8}]  }
   0x1 LB: > { %s5490_s28 = sadd.s32 4294967295, %s6450_s27   ;;  %p5493_p0 = scmp.ge.s32.totalorder %s6450_s27, 1  ;;  %s6450_s27 = sphi %s6530_s27, %s18_s27  }
   0x2   : > { %p313_p1 = scmp.lt.s32.totalorder %s6450_s27, 3 }
   0x4   : > { %p314_p2 = pnand %p5493_p0, %p313_p1 }
   0x5   : > { %p368_p3 = scmp.lt.s32.totalorder (!%p314_p2), %s5490_s28, 1  ;;  %p5504_p4 = scmp.ne.s32.totalorder (!%p314_p2), %s5490_s28, 0 }
   0x6   : > { %317 = sbr.rel (%p314_p2) target bundleno = 6340 (0x18c4), region = 52 }
   0xd   : > { %s6538_s29 = scalar_select %p368_p3, %s5490_s28, 1 }
   0xe   : > { %403 = sbr.rel (%p5504_p4) target bundleno = 21 (0x15), region = 56  ;;  %v404_v0 = vld [vmem:[%s7195_s0] sm:$0xff] (!%p5504_p4)  ;;  %vm406_vm0 = vcmask (!%p5504_p4), 261120   ;;  %v405_v1 = vld [vmem:[%s7195_s0 + $0x8] sm:$0xff] (!%p5504_p4) }
   0xf   : > { %s5736_s30 = sshll.u32 %s6538_s29, 4  ;;  %s375_s11 = scalar_lea.vmem %s7197_s2, %s6538_s29  ;;  %407 = vst.msk [vmem:[%s7203_s8] sm:$0xff] (!%p5504_p4), %vm406_vm0, %v404_v0  ;;  %408 = vst.msk [vmem:[%s7203_s8 + $0x8] sm:$0xff] (!%p5504_p4), %vm406_vm0, %v405_v1 }
  0x10   : > { %s372_s14 = scalar_lea.vmem %s7196_s1, %s5736_s30  ;;  %s6551_s17 = scalar_lea.vmem %s7198_s3, %s5736_s30 }
  0x11   : > { %s5498_s18 = sshll.u32 %s6538_s29, 3  ;;  %s5738_s19 = sshll.u32 %s6538_s29, 8 }
  0x12   : > { %s6558_s22 = scalar_lea.vmem %s7199_s4, %s5498_s18  ;;  %s6563_s25 = scalar_lea.vmem %s7200_s5, %s5738_s19 }
  0x13   : > { %s6568_s10 = scalar_lea.vmem %s7201_s6, %s5736_s30  ;;  %s5739_s12 = sshll.u32 %s6538_s29, 10 }
  0x14   : > { %s6574_s16 = scalar_lea.vmem %s7202_s7, %s5739_s12 }
  0x15 PF: > { %v6238_v2 = vld [vmem:[%s372_s14] sm:$0xff]   ;;  %v6452_v3 = vmov 0.0   ;;  %v6239_v4 = vld [vmem:[%s372_s14 + $0x8] sm:$0xff]   ;;  %vm6453_vm1 = vmmov 0   ;;  %vm435_vm2 = vcmask 261120   ;;  %s6454_s18 = smov 96  }
  0x16   : > { %5986 = vmatprep.subr.bf16.mxu0 %v6452_v3  ;;  %5994 = vmatprep.subr.mxu1 %v6452_v3  ;;  %v409_v5 = vld [vmem:[%s7203_s8] sm:$0xff]  ;;  %v410_v6 = vld [vmem:[%s7203_s8 + $0x8] sm:$0xff]  ;;  %vm483_vm3 = vcmask 31744   ;;  %vm637_vm4 = vcmask 64512   ;;  %s6455_s29 = smov 64   ;;  %s6457_s20 = smov 124  }
  0x17   : > { %5987 = vmatpush3.bf16.msra.mxu0 %v6238_v2  ;;  %5990 = vmatprep.mubr.msk.bf16.mxu0 %vm6453_vm1, %v6452_v3  ;;  %v411_v7 = vpack.c.bf16 %v410_v6, %v409_v5  ;;  %v5505_v8 = vld [vmem:[%s375_s11] ss:$0 sm:$0xff]  ;;  %s6456_s11 = smov 92   ;;  %s6458_s19 = smov 60   ;;  %vm3196_vm5 = vcmask 97280   ;;  %vm3199_vm6 = vcmask 130048  }
  0x18   : > { %5988 = vmatprep.subr.bf16.mxu0 %v6452_v3  ;;  %5996 = vmatprep.mubr.msk.f32.mxu1 %vm6453_vm1, %v6452_v3  ;;  %s6459_s21 = smov 88   ;;  %s6460_s23 = smov 120   ;;  %vm3202_vm7 = vcmask 162816   ;;  %vm3205_vm8 = vcmask 195584   ;;  %vm3208_vm9 = vcmask 228352  }
  0x19   : > { %s6461_s30 = smov 56   ;;  %s6462_s24 = smov 84  }
  0x1a   : > { %s6463_s26 = smov 116   ;;  %s6464_s28 = smov 52  }
  0x1b   : > { %5989 = vmatpush3.bf16.msra.mxu0 %v6239_v4  ;;  %s6465_s9 = smov 80   ;;  %s6466_s12 = smov 112  }
  0x1c   : > { %6009 = vmatprep.subr.mxu0 %v6452_v3  ;;  %s6467_s13 = smov 48   ;;  %s6468_s14 = smov 76  }
  0x1d   : > { %s6469_s15 = smov 108  }
  0x1e   : > { %5991 = vmatmul.mubr.msk.bf16.vlgmr.msra.gmra.mrb[0].mxu0 %vm435_vm2, %v411_v7 }
  0x1f   : > { %6011 = vmatprep.mubr.msk.f32.mxu0 %vm6453_vm1, %v6452_v3 }
  0xf1   : > { %v473_v9 = vpop.f32.mrb[0].mxu0 }
  0xf2   : > { %v6610_v10 = vadd.f32 %v5505_v8, %v473_v9  ;;  %v5992_v11 = vpop.f32.mrb[1].mxu0 }
  0xf3   : > { %v476_v12 = vpop.f32.mrb[2].mxu0 }
  0xf4   : > { %481 = vrot.lane.b32.xlu0 %v6610_v10, %s6454_s18  ;;  %v5993_v13 = vpop.f32.mrb[3].mxu0  ;;  %v6613_v14 = vadd.f32 %v5505_v8, %v476_v12 }
  0xf8   : > { %559 = vrot.lane.b32.xlu0 %v6613_v14, %s6454_s18  ;;  %s6470_s18 = smov 44  }
 0x166   : > { %v482_v15 = vpop.permute.xlu0 %481 }
 0x167   : > { %5995 = vmatpush3.xpose.msk.msra.mxu1 %vm483_vm3, %v482_v15 }
 0x168   : > { %5999 = vmatprep.subr.mxu1 %v6452_v3 }
 0x16a   : > { %5997 = vmatmul.mubr.msk.f32.vlgmr.msra.gmra.mrb[0].mxu1 %vm483_vm3, %v6610_v10  ;;  %v560_v16 = vpop.permute.xlu0 %559 }
 0x16b   : > { %6000 = vmatpush3.xpose.msk.msra.mxu1 %vm483_vm3, %v560_v16  ;;  %6001 = vmatprep.mubr.msk.f32.mxu1 %vm6453_vm1, %v6452_v3 }
 0x16c   : > { %6004 = vmatprep.subr.mxu1 %v6452_v3 }
 0x16e   : > { %6002 = vmatmul.mubr.msk.f32.vlgmr.msra.gmra.mrb[2].mxu1 %vm483_vm3, %v6613_v14 }
 0x16f   : > { %6006 = vmatprep.mubr.msk.f32.mxu1 %vm6453_vm1, %v6452_v3 }
 0x23d   : > { %v554_v17 = vpop.f32.mrb[0].mxu1 }
 0x23e   : > { %v635_v18 = vmul.f32 0.5, %v554_v17  ;;  %v5998_v19 = vpop.f32.mrb[1].mxu1 }
 0x240   : > { %v638_v20 = vsel %vm637_vm4, %v635_v18, -inf }
 0x241   : > { %639 = vmax.xlane.f32.xlu1 %v638_v20  ;;  %v631_v21 = vpop.f32.mrb[2].mxu1 }
 0x242   : > { %v636_v22 = vmul.f32 0.5, %v631_v21  ;;  %v6003_v23 = vpop.f32.mrb[3].mxu1 }
 0x244   : > { %v641_v24 = vsel %vm637_vm4, %v636_v22, -inf }
 0x245   : > { %642 = vmax.xlane.f32.xlu1 %v641_v24 }
 0x256   : > { %660 = vrot.lane.b32.xlu1 %v6610_v10, %s6455_s29 }
 0x25a   : > { %736 = vrot.lane.b32.xlu1 %v6613_v14, %s6455_s29  ;;  %s6471_s29 = smov 72  }
 0x25e   : > { %814 = vrot.lane.b32.xlu1 %v6610_v10, %s6456_s11 }
 0x262   : > { %892 = vrot.lane.b32.xlu1 %v6613_v14, %s6456_s11  ;;  %s6472_s11 = smov 104  }
 0x2ce   : > { %v640_v25 = vpop.xlane.xlu1 %639 }
 0x2cf   : > { %v644_v26 = vsub.f32 %v635_v18, %v640_v25 }
 0x2d1   : > { %v646_v27 = vmul.f32 1.442695, %v644_v26 }
 0x2d2   : > { %v643_v28 = vpop.xlane.xlu1 %642 }
 0x2d3   : > { %6370 = vpow2.f32 %v646_v27  ;;  %v645_v29 = vsub.f32 %v636_v22, %v643_v28 }
 0x2d5   : > { %v648_v30 = vmul.f32 1.442695, %v645_v29 }
 0x2d6   : > { %v661_v31 = vpop.permute.xlu1 %660 }
 0x2d7   : > { %6372 = vpow2.f32 %v648_v30  ;;  %6005 = vmatpush3.msra.mxu1 %v661_v31 }
 0x2d8   : > { %6014 = vmatprep.subr.mxu1 %v6452_v3 }
 0x2da   : > { %v737_v32 = vpop.permute.xlu1 %736 }
 0x2db   : > { %6010 = vmatpush3.msra.mxu0 %v737_v32 }
 0x2dc   : > { %6019 = vmatprep.subr.mxu0 %v6452_v3 }
 0x2dd   : > { %v6371_v33 = vpop.eup %6370 }
 0x2de   : > { %v650_v34 = vsel %vm637_vm4, %v6371_v33, 0.0  ;;  %v815_v37 = vpop.permute.xlu1 %814 }
 0x2df   : > { %651 = vadd.xlane.f32.xlu0 %v650_v34 }
 0x2e1   : > { %v6373_v35 = vpop.eup %6372 }
 0x2e2   : > { %v653_v36 = vsel %vm637_vm4, %v6373_v35, 0.0  ;;  %v893_v38 = vpop.permute.xlu1 %892 }
 0x2e3   : > { %654 = vadd.xlane.f32.xlu1 %v653_v36 }
 0x2f4   : > { %890 = vrot.lane.b32.xlu1 %v6613_v14, %s6457_s20 }
 0x2f5   : > { %812 = vrot.lane.b32.xlu0 %v6610_v10, %s6457_s20  ;;  %s6473_s20 = smov 40  }
 0x36c   : > { %v652_v39 = vpop.xlane.xlu0 %651 }
 0x36d   : > { %6374 = vrcp.f32 %v652_v39 }
 0x370   : > { %v655_v40 = vpop.xlane.xlu1 %654  ;;  %v813_v45 = vpop.permute.xlu0 %812 }
 0x371   : > { %6376 = vrcp.f32 %v655_v40 }
 0x374   : > { %v891_v46 = vpop.permute.xlu1 %890 }
 0x377   : > { %v6375_v41 = vpop.eup %6374 }
 0x378   : > { %v658_v42 = vmul.f32 %v6375_v41, %v6371_v33 }
 0x37a   : > { %6007 = vmatmul.mubr.msk.f32.vlgmr.msra.gmra.mrb[4].mxu1 %vm637_vm4, %v658_v42 }
 0x37b   : > { %v6377_v43 = vpop.eup %6376  ;;  %6015 = vmatpush3.xpose.msk.msra.mxu1 %vm483_vm3, %v815_v37  ;;  %6016 = vmatprep.mubr.msk.f32.mxu1 %vm6453_vm1, %v6452_v3 }
 0x37c   : > { %v659_v44 = vmul.f32 %v6377_v43, %v6373_v35  ;;  %6024 = vmatprep.subr.mxu1 %v6452_v3 }
 0x37e   : > { %6012 = vmatmul.mubr.msk.f32.vlgmr.msra.gmra.mrb[4].mxu0 %vm637_vm4, %v659_v44  ;;  %6017 = vmatmul.mubr.msk.f32.vlgmr.msra.gmra.mrb[6].mxu1 %vm483_vm3, %v813_v45 }
 0x37f   : > { %6020 = vmatpush3.xpose.msk.msra.mxu0 %vm483_vm3, %v893_v38  ;;  %6021 = vmatprep.mubr.msk.f32.mxu0 %vm6453_vm1, %v6452_v3 }
 0x380   : > { %6029 = vmatprep.subr.mxu0 %v6452_v3  ;;  %6026 = vmatprep.mubr.msk.f32.mxu1 %vm6453_vm1, %v6452_v3 }
 0x382   : > { %6022 = vmatmul.mubr.msk.f32.vlgmr.msra.gmra.mrb[6].mxu0 %vm483_vm3, %v891_v46 }
 0x383   : > { %6031 = vmatprep.mubr.msk.f32.mxu0 %vm6453_vm1, %v6452_v3 }
 0x44d   : > { %v6656_v47 = vpop.f32.mrb[4].mxu1 }
 0x44e   : > { %v6008_v48 = vpop.f32.mrb[5].mxu1 }
 0x451   : > { %v6658_v49 = vpop.f32.mrb[4].mxu0  ;;  %v886_v50 = vpop.f32.mrb[6].mxu1 }
 0x452   : > { %v968_v51 = vmul.f32 0.5, %v886_v50  ;;  %v6013_v52 = vpop.f32.mrb[5].mxu0  ;;  %v6018_v53 = vpop.f32.mrb[7].mxu1 }
 0x454   : > { %v970_v54 = vsel %vm637_vm4, %v968_v51, -inf }
 0x455   : > { %971 = vmax.xlane.f32.xlu1 %v970_v54  ;;  %v964_v55 = vpop.f32.mrb[6].mxu0 }
 0x456   : > { %v969_v56 = vmul.f32 0.5, %v964_v55  ;;  %v6023_v57 = vpop.f32.mrb[7].mxu0 }
 0x458   : > { %v973_v58 = vsel %vm637_vm4, %v969_v56, -inf }
 0x459   : > { %974 = vmax.xlane.f32.xlu0 %v973_v58 }
 0x466   : > { %992 = vrot.lane.b32.xlu1 %v6610_v10, %s6458_s19 }
 0x46a   : > { %1146 = vrot.lane.b32.xlu1 %v6610_v10, %s6459_s21 }
 0x46e   : > { %1224 = vrot.lane.b32.xlu1 %v6613_v14, %s6459_s21  ;;  %s6475_s21 = smov 100  }
 0x46f   : > { %1068 = vrot.lane.b32.xlu0 %v6613_v14, %s6458_s19  ;;  %s6474_s19 = smov 68  }
 0x473   : > { %1144 = vrot.lane.b32.xlu0 %v6610_v10, %s6460_s23 }
 0x4e2   : > { %v972_v59 = vpop.xlane.xlu1 %971 }
 0x4e3   : > { %v976_v60 = vsub.f32 %v968_v51, %v972_v59 }
 0x4e5   : > { %v978_v61 = vmul.f32 1.442695, %v976_v60 }
 0x4e6   : > { %v993_v62 = vpop.permute.xlu1 %992  ;;  %v975_v63 = vpop.xlane.xlu0 %974 }
 0x4e7   : > { %6378 = vpow2.f32 %v978_v61  ;;  %v977_v0 = vsub.f32 %v969_v56, %v975_v63  ;;  %6025 = vmatpush3.msra.mxu1 %v993_v62 }
 0x4e8   : > { %6034 = vmatprep.subr.mxu1 %v6452_v3 }
 0x4e9   : > { %v980_v1 = vmul.f32 1.442695, %v977_v0 }
 0x4ea   : > { %v1069_v2 = vpop.permute.xlu0 %1068  ;;  %v1147_v8 = vpop.permute.xlu1 %1146 }
 0x4eb   : > { %6380 = vpow2.f32 %v980_v1  ;;  %6030 = vmatpush3.msra.mxu0 %v1069_v2 }
 0x4ec   : > { %6039 = vmatprep.subr.mxu0 %v6452_v3 }
 0x4ee   : > { %v1225_v9 = vpop.permute.xlu1 %1224  ;;  %v1145_v18 = vpop.permute.xlu0 %1144 }
 0x4f1   : > { %v6379_v4 = vpop.eup %6378 }
 0x4f2   : > { %v982_v5 = vsel %vm637_vm4, %v6379_v4, 0.0 }
 0x4f3   : > { %983 = vadd.xlane.f32.xlu1 %v982_v5 }
 0x4f5   : > { %v6381_v6 = vpop.eup %6380 }
 0x4f6   : > { %v985_v7 = vsel %vm637_vm4, %v6381_v6, 0.0 }
 0x4f7   : > { %986 = vadd.xlane.f32.xlu1 %v985_v7 }
 0x508   : > { %1222 = vrot.lane.b32.xlu1 %v6613_v14, %s6460_s23  ;;  %s6476_s23 = smov 36  }
 0x580   : > { %v984_v11 = vpop.xlane.xlu1 %983 }
 0x581   : > { %6382 = vrcp.f32 %v984_v11 }
 0x584   : > { %v987_v12 = vpop.xlane.xlu1 %986 }
 0x585   : > { %6384 = vrcp.f32 %v987_v12 }
 0x588   : > { %v1223_v19 = vpop.permute.xlu1 %1222 }
 0x58b   : > { %v6383_v13 = vpop.eup %6382 }
 0x58c   : > { %v990_v15 = vmul.f32 %v6383_v13, %v6379_v4 }
 0x58e   : > { %6027 = vmatmul.mubr.msk.f32.vlgmr.msra.gmra.mrb[8].mxu1 %vm637_vm4, %v990_v15 }
 0x58f   : > { %v6385_v16 = vpop.eup %6384  ;;  %6035 = vmatpush3.xpose.msk.msra.mxu1 %vm483_vm3, %v1147_v8  ;;  %6036 = vmatprep.mubr.msk.f32.mxu1 %vm6453_vm1, %v6452_v3 }
 0x590   : > { %v991_v17 = vmul.f32 %v6385_v16, %v6381_v6  ;;  %6044 = vmatprep.subr.mxu1 %v6452_v3 }
 0x592   : > { %6032 = vmatmul.mubr.msk.f32.vlgmr.msra.gmra.mrb[8].mxu0 %vm637_vm4, %v991_v17  ;;  %6037 = vmatmul.mubr.msk.f32.vlgmr.msra.gmra.mrb[10].mxu1 %vm483_vm3, %v1145_v18 }
 0x593   : > { %6040 = vmatpush3.xpose.msk.msra.mxu0 %vm483_vm3, %v1225_v9  ;;  %6041 = vmatprep.mubr.msk.f32.mxu0 %vm6453_vm1, %v6452_v3 }
 0x594   : > { %6049 = vmatprep.subr.mxu0 %v6452_v3  ;;  %6046 = vmatprep.mubr.msk.f32.mxu1 %vm6453_vm1, %v6452_v3 }
 0x596   : > { %6042 = vmatmul.mubr.msk.f32.vlgmr.msra.gmra.mrb[10].mxu0 %vm483_vm3, %v1223_v19 }
 0x597   : > { %6051 = vmatprep.mubr.msk.f32.mxu0 %vm6453_vm1, %v6452_v3 }
 0x661   : > { %v6688_v20 = vpop.f32.mrb[8].mxu1 }
 0x662   : > { %v6028_v21 = vpop.f32.mrb[9].mxu1 }
 0x665   : > { %v6690_v22 = vpop.f32.mrb[8].mxu0  ;;  %v1218_v23 = vpop.f32.mrb[10].mxu1 }
 0x666   : > { %v6203_v24 = vpack.i.bf16 %v6690_v22, %v6688_v20  ;;  %v1300_v25 = vmul.f32 0.5, %v1218_v23  ;;  %v6033_v26 = vpop.f32.mrb[9].mxu0  ;;  %v6038_v27 = vpop.f32.mrb[11].mxu1 }
 0x668   : > { %v1302_v28 = vsel %vm637_vm4, %v1300_v25, -inf }
 0x669   : > { %1303 = vmax.xlane.f32.xlu0 %v1302_v28  ;;  %v1296_v29 = vpop.f32.mrb[10].mxu0 }
 0x66a   : > { %v1301_v30 = vmul.f32 0.5, %v1296_v29  ;;  %v6043_v31 = vpop.f32.mrb[11].mxu0 }
 0x66c   : > { %v1305_v32 = vsel %vm637_vm4, %v1301_v30, -inf }
 0x66d   : > { %1306 = vmax.xlane.f32.xlu1 %v1305_v32 }
 0x67e   : > { %1324 = vrot.lane.b32.xlu1 %v6610_v10, %s6461_s30 }
 0x67f   : > { %1400 = vrot.lane.b32.xlu0 %v6613_v14, %s6461_s30  ;;  %s6477_s30 = smov 4  }
 0x682   : > { %1478 = vrot.lane.b32.xlu1 %v6610_v10, %s6462_s24 }
 0x686   : > { %1556 = vrot.lane.b32.xlu1 %v6613_v14, %s6462_s24  ;;  %s6478_s24 = smov 8  }
 0x68a   : > { %1554 = vrot.lane.b32.xlu1 %v6613_v14, %s6463_s26 }
 0x6f6   : > { %v1304_v33 = vpop.xlane.xlu0 %1303 }
 0x6f7   : > { %v1308_v34 = vsub.f32 %v1300_v25, %v1304_v33 }
 0x6f9   : > { %v1310_v35 = vmul.f32 1.442695, %v1308_v34 }
 0x6fa   : > { %v1401_v36 = vpop.permute.xlu0 %1400  ;;  %v1307_v37 = vpop.xlane.xlu1 %1306 }
 0x6fb   : > { %6386 = vpow2.f32 %v1310_v35  ;;  %v1309_v38 = vsub.f32 %v1301_v30, %v1307_v37  ;;  %6050 = vmatpush3.msra.mxu0 %v1401_v36 }
 0x6fc   : > { %6059 = vmatprep.subr.mxu0 %v6452_v3 }
 0x6fd   : > { %v1312_v39 = vmul.f32 1.442695, %v1309_v38 }
 0x6fe   : > { %v1325_v40 = vpop.permute.xlu1 %1324 }
 0x6ff   : > { %6388 = vpow2.f32 %v1312_v39  ;;  %6045 = vmatpush3.msra.mxu1 %v1325_v40 }
 0x700   : > { %6054 = vmatprep.subr.mxu1 %v6452_v3 }
 0x702   : > { %v1479_v48 = vpop.permute.xlu1 %1478 }
 0x705   : > { %v6387_v41 = vpop.eup %6386 }
 0x706   : > { %v1314_v42 = vsel %vm637_vm4, %v6387_v41, 0.0  ;;  %v1557_v53 = vpop.permute.xlu1 %1556 }
 0x707   : > { %1315 = vadd.xlane.f32.xlu0 %v1314_v42 }
 0x709   : > { %v6389_v43 = vpop.eup %6388 }
 0x70a   : > { %v1317_v44 = vsel %vm637_vm4, %v6389_v43, 0.0  ;;  %v1555_v56 = vpop.permute.xlu1 %1554 }
 0x70b   : > { %1318 = vadd.xlane.f32.xlu0 %v1317_v44 }
 0x721   : > { %1476 = vrot.lane.b32.xlu0 %v6610_v10, %s6463_s26  ;;  %s6479_s26 = smov 16  }
 0x794   : > { %v1316_v45 = vpop.xlane.xlu0 %1315 }
 0x795   : > { %6390 = vrcp.f32 %v1316_v45 }
 0x798   : > { %v1319_v46 = vpop.xlane.xlu0 %1318 }
 0x799   : > { %6392 = vrcp.f32 %v1319_v46 }
 0x79c   : > { %v1477_v55 = vpop.permute.xlu0 %1476 }
 0x79f   : > { %v6391_v50 = vpop.eup %6390 }
 0x7a0   : > { %v1322_v51 = vmul.f32 %v6391_v50, %v6387_v41 }
 0x7a2   : > { %6047 = vmatmul.mubr.msk.f32.vlgmr.msra.gmra.mrb[12].mxu1 %vm637_vm4, %v1322_v51 }
 0x7a3   : > { %v6393_v52 = vpop.eup %6392  ;;  %6055 = vmatpush3.xpose.msk.msra.mxu1 %vm483_vm3, %v1479_v48  ;;  %6056 = vmatprep.mubr.msk.f32.mxu1 %vm6453_vm1, %v6452_v3 }
 0x7a4   : > { %v1323_v54 = vmul.f32 %v6393_v52, %v6389_v43  ;;  %6064 = vmatprep.subr.mxu1 %v6452_v3 }
 0x7a6   : > { %6052 = vmatmul.mubr.msk.f32.vlgmr.msra.gmra.mrb[12].mxu0 %vm637_vm4, %v1323_v54  ;;  %6057 = vmatmul.mubr.msk.f32.vlgmr.msra.gmra.mrb[14].mxu1 %vm483_vm3, %v1477_v55 }
 0x7a7   : > { %6060 = vmatpush3.xpose.msk.msra.mxu0 %vm483_vm3, %v1557_v53  ;;  %6061 = vmatprep.mubr.msk.f32.mxu0 %vm6453_vm1, %v6452_v3 }
 0x7a8   : > { %6069 = vmatprep.subr.mxu0 %v6452_v3  ;;  %6066 = vmatprep.mubr.msk.f32.mxu1 %vm6453_vm1, %v6452_v3 }
 0x7aa   : > { %6062 = vmatmul.mubr.msk.f32.vlgmr.msra.gmra.mrb[14].mxu0 %vm483_vm3, %v1555_v56 }
 0x7ab   : > { %6071 = vmatprep.mubr.msk.f32.mxu0 %vm6453_vm1, %v6452_v3 }
 0x875   : > { %v6722_v57 = vpop.f32.mrb[12].mxu1 }
 0x876   : > { %v6048_v58 = vpop.f32.mrb[13].mxu1 }
 0x879   : > { %v6724_v59 = vpop.f32.mrb[12].mxu0  ;;  %v1550_v60 = vpop.f32.mrb[14].mxu1 }
 0x87a   : > { %v6208_v61 = vpack.i.bf16 %v6724_v59, %v6722_v57  ;;  %v1632_v62 = vmul.f32 0.5, %v1550_v60  ;;  %v6053_v63 = vpop.f32.mrb[13].mxu0  ;;  %v6058_v0 = vpop.f32.mrb[15].mxu1 }
 0x87c   : > { %v1634_v1 = vsel %vm637_vm4, %v1632_v62, -inf }
 0x87d   : > { %1635 = vmax.xlane.f32.xlu0 %v1634_v1  ;;  %v1628_v2 = vpop.f32.mrb[14].mxu0 }
 0x87e   : > { %v1633_v4 = vmul.f32 0.5, %v1628_v2  ;;  %v6063_v5 = vpop.f32.mrb[15].mxu0 }
 0x880   : > { %v1637_v6 = vsel %vm637_vm4, %v1633_v4, -inf }
 0x881   : > { %1638 = vmax.xlane.f32.xlu1 %v1637_v6 }
 0x892   : > { %1656 = vrot.lane.b32.xlu1 %v6610_v10, %s6464_s28 }
 0x893   : > { %1732 = vrot.lane.b32.xlu0 %v6613_v14, %s6464_s28  ;;  %s6480_s28 = smov 24  }
 0x896   : > { %1810 = vrot.lane.b32.xlu1 %v6610_v10, %s6465_s9 }
 0x89a   : > { %1888 = vrot.lane.b32.xlu1 %v6613_v14, %s6465_s9  ;;  %s6481_s9 = smov 12  }
 0x89e   : > { %1886 = vrot.lane.b32.xlu1 %v6613_v14, %s6466_s12 }
 0x90a   : > { %v1636_v7 = vpop.xlane.xlu0 %1635 }
 0x90b   : > { %v1640_v8 = vsub.f32 %v1632_v62, %v1636_v7 }
 0x90d   : > { %v1642_v9 = vmul.f32 1.442695, %v1640_v8 }
 0x90e   : > { %v1733_v11 = vpop.permute.xlu0 %1732  ;;  %v1639_v12 = vpop.xlane.xlu1 %1638 }
 0x90f   : > { %6394 = vpow2.f32 %v1642_v9  ;;  %v1641_v13 = vsub.f32 %v1633_v4, %v1639_v12  ;;  %6070 = vmatpush3.msra.mxu0 %v1733_v11 }
 0x910   : > { %6079 = vmatprep.subr.mxu0 %v6452_v3 }
 0x911   : > { %v1644_v15 = vmul.f32 1.442695, %v1641_v13 }
 0x912   : > { %v1657_v16 = vpop.permute.xlu1 %1656 }
 0x913   : > { %6396 = vpow2.f32 %v1644_v15  ;;  %6065 = vmatpush3.msra.mxu1 %v1657_v16 }
 0x914   : > { %6074 = vmatprep.subr.mxu1 %v6452_v3 }
 0x916   : > { %v1811_v26 = vpop.permute.xlu1 %1810 }
 0x919   : > { %v6395_v17 = vpop.eup %6394 }
 0x91a   : > { %v1646_v18 = vsel %vm637_vm4, %v6395_v17, 0.0  ;;  %v1889_v30 = vpop.permute.xlu1 %1888 }
 0x91b   : > { %1647 = vadd.xlane.f32.xlu0 %v1646_v18 }
 0x91d   : > { %v6397_v19 = vpop.eup %6396 }
 0x91e   : > { %v1649_v21 = vsel %vm637_vm4, %v6397_v19, 0.0  ;;  %v1887_v33 = vpop.permute.xlu1 %1886 }
 0x91f   : > { %1650 = vadd.xlane.f32.xlu0 %v1649_v21 }
 0x935   : > { %1808 = vrot.lane.b32.xlu0 %v6610_v10, %s6466_s12  ;;  %s6482_s12 = smov 20  }
 0x9a8   : > { %v1648_v23 = vpop.xlane.xlu0 %1647 }
 0x9a9   : > { %6398 = vrcp.f32 %v1648_v23 }
 0x9ac   : > { %v1651_v25 = vpop.xlane.xlu0 %1650 }
 0x9ad   : > { %6400 = vrcp.f32 %v1651_v25 }
 0x9b0   : > { %v1809_v32 = vpop.permute.xlu0 %1808 }
 0x9b3   : > { %v6399_v27 = vpop.eup %6398 }
 0x9b4   : > { %v1654_v28 = vmul.f32 %v6399_v27, %v6395_v17 }
 0x9b6   : > { %6067 = vmatmul.mubr.msk.f32.vlgmr.msra.gmra.mrb[16].mxu1 %vm637_vm4, %v1654_v28 }
 0x9b7   : > { %v6401_v29 = vpop.eup %6400  ;;  %6075 = vmatpush3.xpose.msk.msra.mxu1 %vm483_vm3, %v1811_v26  ;;  %6076 = vmatprep.mubr.msk.f32.mxu1 %vm6453_vm1, %v6452_v3 }
 0x9b8   : > { %v1655_v31 = vmul.f32 %v6401_v29, %v6397_v19  ;;  %6084 = vmatprep.subr.mxu1 %v6452_v3 }
 0x9ba   : > { %6072 = vmatmul.mubr.msk.f32.vlgmr.msra.gmra.mrb[16].mxu0 %vm637_vm4, %v1655_v31  ;;  %6077 = vmatmul.mubr.msk.f32.vlgmr.msra.gmra.mrb[18].mxu1 %vm483_vm3, %v1809_v32 }
 0x9bb   : > { %6080 = vmatpush3.xpose.msk.msra.mxu0 %vm483_vm3, %v1889_v30  ;;  %6081 = vmatprep.mubr.msk.f32.mxu0 %vm6453_vm1, %v6452_v3 }
 0x9bc   : > { %6089 = vmatprep.subr.mxu0 %v6452_v3  ;;  %6086 = vmatprep.mubr.msk.f32.mxu1 %vm6453_vm1, %v6452_v3 }
 0x9be   : > { %6082 = vmatmul.mubr.msk.f32.vlgmr.msra.gmra.mrb[18].mxu0 %vm483_vm3, %v1887_v33 }
 0x9bf   : > { %6091 = vmatprep.mubr.msk.f32.mxu0 %vm6453_vm1, %v6452_v3 }
 0xa89   : > { %v6756_v34 = vpop.f32.mrb[16].mxu1 }
 0xa8a   : > { %v6068_v35 = vpop.f32.mrb[17].mxu1 }
 0xa8d   : > { %v6758_v36 = vpop.f32.mrb[16].mxu0  ;;  %v1882_v37 = vpop.f32.mrb[18].mxu1 }
 0xa8e   : > { %v6213_v38 = vpack.i.bf16 %v6758_v36, %v6756_v34  ;;  %v1964_v39 = vmul.f32 0.5, %v1882_v37  ;;  %v6073_v40 = vpop.f32.mrb[17].mxu0  ;;  %v6078_v41 = vpop.f32.mrb[19].mxu1  ;;  %v6240_v36 = vld [vmem:[%s6551_s17] sm:$0xff]  }
 0xa90   : > { %v1966_v42 = vsel %vm637_vm4, %v1964_v39, -inf }
 0xa91   : > { %1967 = vmax.xlane.f32.xlu0 %v1966_v42  ;;  %v1960_v43 = vpop.f32.mrb[18].mxu0 }
 0xa92   : > { %v1965_v44 = vmul.f32 0.5, %v1960_v43  ;;  %v6083_v45 = vpop.f32.mrb[19].mxu0 }
 0xa94   : > { %v1969_v46 = vsel %vm637_vm4, %v1965_v44, -inf }
 0xa95   : > { %1970 = vmax.xlane.f32.xlu1 %v1969_v46 }
 0xaa6   : > { %1988 = vrot.lane.b32.xlu1 %v6610_v10, %s6467_s13 }
 0xaa7   : > { %2064 = vrot.lane.b32.xlu0 %v6613_v14, %s6467_s13  ;;  %s6483_s13 = smov 28  }
 0xaaa   : > { %2142 = vrot.lane.b32.xlu1 %v6610_v10, %s6468_s14 }
 0xaae   : > { %2220 = vrot.lane.b32.xlu1 %v6613_v14, %s6468_s14 }
 0xab2   : > { %2218 = vrot.lane.b32.xlu1 %v6613_v14, %s6469_s15 }
 0xb1e   : > { %v1968_v48 = vpop.xlane.xlu0 %1967 }
 0xb1f   : > { %v1972_v50 = vsub.f32 %v1964_v39, %v1968_v48 }
 0xb21   : > { %v1974_v51 = vmul.f32 1.442695, %v1972_v50 }
 0xb22   : > { %v2065_v52 = vpop.permute.xlu0 %2064  ;;  %v1971_v53 = vpop.xlane.xlu1 %1970 }
 0xb23   : > { %6402 = vpow2.f32 %v1974_v51  ;;  %v1973_v54 = vsub.f32 %v1965_v44, %v1971_v53  ;;  %6090 = vmatpush3.msra.mxu0 %v2065_v52 }
 0xb24   : > { %6099 = vmatprep.subr.mxu0 %v6452_v3 }
 0xb25   : > { %v1976_v55 = vmul.f32 1.442695, %v1973_v54 }
 0xb26   : > { %v1989_v56 = vpop.permute.xlu1 %1988 }
 0xb27   : > { %6404 = vpow2.f32 %v1976_v55  ;;  %6085 = vmatpush3.msra.mxu1 %v1989_v56 }
 0xb28   : > { %6094 = vmatprep.subr.mxu1 %v6452_v3 }
 0xb2a   : > { %v2143_v2 = vpop.permute.xlu1 %2142 }
 0xb2d   : > { %v6403_v58 = vpop.eup %6402 }
 0xb2e   : > { %v1978_v60 = vsel %vm637_vm4, %v6403_v58, 0.0  ;;  %v2221_v7 = vpop.permute.xlu1 %2220 }
 0xb2f   : > { %1979 = vadd.xlane.f32.xlu0 %v1978_v60 }
 0xb31   : > { %v6405_v62 = vpop.eup %6404 }
 0xb32   : > { %v1981_v63 = vsel %vm637_vm4, %v6405_v62, 0.0  ;;  %v2219_v11 = vpop.permute.xlu1 %2218 }
 0xb33   : > { %1982 = vadd.xlane.f32.xlu0 %v1981_v63 }
 0xb49   : > { %2140 = vrot.lane.b32.xlu0 %v6610_v10, %s6469_s15 }
 0xbbc   : > { %v1980_v0 = vpop.xlane.xlu0 %1979 }
 0xbbd   : > { %6406 = vrcp.f32 %v1980_v0 }
 0xbc0   : > { %v1983_v1 = vpop.xlane.xlu0 %1982 }
 0xbc1   : > { %6408 = vrcp.f32 %v1983_v1 }
 0xbc4   : > { %v2141_v9 = vpop.permute.xlu0 %2140 }
 0xbc7   : > { %v6407_v4 = vpop.eup %6406 }
 0xbc8   : > { %v1986_v5 = vmul.f32 %v6407_v4, %v6403_v58 }
 0xbca   : > { %6087 = vmatmul.mubr.msk.f32.vlgmr.msra.gmra.mrb[20].mxu1 %vm637_vm4, %v1986_v5 }
 0xbcb   : > { %v6409_v6 = vpop.eup %6408  ;;  %6095 = vmatpush3.xpose.msk.msra.mxu1 %vm483_vm3, %v2143_v2  ;;  %6096 = vmatprep.mubr.msk.f32.mxu1 %vm6453_vm1, %v6452_v3 }
 0xbcc   : > { %v1987_v8 = vmul.f32 %v6409_v6, %v6405_v62  ;;  %6104 = vmatprep.subr.mxu1 %v6452_v3 }
 0xbce   : > { %6092 = vmatmul.mubr.msk.f32.vlgmr.msra.gmra.mrb[20].mxu0 %vm637_vm4, %v1987_v8  ;;  %6097 = vmatmul.mubr.msk.f32.vlgmr.msra.gmra.mrb[22].mxu1 %vm483_vm3, %v2141_v9 }
 0xbcf   : > { %6100 = vmatpush3.xpose.msk.msra.mxu0 %vm483_vm3, %v2221_v7  ;;  %6101 = vmatprep.mubr.msk.f32.mxu0 %vm6453_vm1, %v6452_v3 }
 0xbd0   : > { %6109 = vmatprep.subr.mxu0 %v6452_v3  ;;  %6106 = vmatprep.mubr.msk.f32.mxu1 %vm6453_vm1, %v6452_v3 }
 0xbd2   : > { %6102 = vmatmul.mubr.msk.f32.vlgmr.msra.gmra.mrb[22].mxu0 %vm483_vm3, %v2219_v11 }
 0xbd3   : > { %6111 = vmatprep.mubr.msk.f32.mxu0 %vm6453_vm1, %v6452_v3 }
 0xc9d   : > { %v6790_v12 = vpop.f32.mrb[20].mxu1 }
 0xc9e   : > { %v6088_v13 = vpop.f32.mrb[21].mxu1 }
 0xca1   : > { %v6792_v15 = vpop.f32.mrb[20].mxu0  ;;  %v2214_v16 = vpop.f32.mrb[22].mxu1 }
 0xca2   : > { %v6218_v17 = vpack.i.bf16 %v6792_v15, %v6790_v12  ;;  %v2296_v18 = vmul.f32 0.5, %v2214_v16  ;;  %v6093_v19 = vpop.f32.mrb[21].mxu0  ;;  %v6098_v21 = vpop.f32.mrb[23].mxu1 }
 0xca4   : > { %v2298_v23 = vsel %vm637_vm4, %v2296_v18, -inf }
 0xca5   : > { %2299 = vmax.xlane.f32.xlu0 %v2298_v23  ;;  %v2292_v25 = vpop.f32.mrb[22].mxu0 }
 0xca6   : > { %v2297_v26 = vmul.f32 0.5, %v2292_v25  ;;  %v6103_v27 = vpop.f32.mrb[23].mxu0 }
 0xca8   : > { %v2301_v28 = vsel %vm637_vm4, %v2297_v26, -inf }
 0xca9   : > { %2302 = vmax.xlane.f32.xlu1 %v2301_v28 }
 0xcba   : > { %2320 = vrot.lane.b32.xlu1 %v6610_v10, %s6470_s18 }
 0xcbb   : > { %2396 = vrot.lane.b32.xlu0 %v6613_v14, %s6470_s18 }
 0xcbe   : > { %2474 = vrot.lane.b32.xlu1 %v6610_v10, %s6471_s29 }
 0xcc2   : > { %2552 = vrot.lane.b32.xlu1 %v6613_v14, %s6471_s29 }
 0xcc6   : > { %2550 = vrot.lane.b32.xlu1 %v6613_v14, %s6472_s11 }
 0xd32   : > { %v2300_v29 = vpop.xlane.xlu0 %2299 }
 0xd33   : > { %v2304_v30 = vsub.f32 %v2296_v18, %v2300_v29 }
 0xd35   : > { %v2306_v31 = vmul.f32 1.442695, %v2304_v30 }
 0xd36   : > { %v2397_v32 = vpop.permute.xlu0 %2396  ;;  %v2303_v33 = vpop.xlane.xlu1 %2302 }
 0xd37   : > { %6410 = vpow2.f32 %v2306_v31  ;;  %v2305_v35 = vsub.f32 %v2297_v26, %v2303_v33  ;;  %6110 = vmatpush3.msra.mxu0 %v2397_v32 }
 0xd38   : > { %6119 = vmatprep.subr.mxu0 %v6452_v3 }
 0xd39   : > { %v2308_v37 = vmul.f32 1.442695, %v2305_v35 }
 0xd3a   : > { %v2321_v39 = vpop.permute.xlu1 %2320 }
 0xd3b   : > { %6412 = vpow2.f32 %v2308_v37  ;;  %6105 = vmatpush3.msra.mxu1 %v2321_v39 }
 0xd3c   : > { %6114 = vmatprep.subr.mxu1 %v6452_v3 }
 0xd3e   : > { %v2475_v46 = vpop.permute.xlu1 %2474 }
 0xd41   : > { %v6411_v40 = vpop.eup %6410 }
 0xd42   : > { %v2310_v41 = vsel %vm637_vm4, %v6411_v40, 0.0  ;;  %v2553_v52 = vpop.permute.xlu1 %2552 }
 0xd43   : > { %2311 = vadd.xlane.f32.xlu0 %v2310_v41 }
 0xd45   : > { %v6413_v42 = vpop.eup %6412 }
 0xd46   : > { %v2313_v43 = vsel %vm637_vm4, %v6413_v42, 0.0  ;;  %v2551_v55 = vpop.permute.xlu1 %2550 }
 0xd47   : > { %2314 = vadd.xlane.f32.xlu0 %v2313_v43 }
 0xd5d   : > { %2472 = vrot.lane.b32.xlu0 %v6610_v10, %s6472_s11 }
 0xdd0   : > { %v2312_v44 = vpop.xlane.xlu0 %2311 }
 0xdd1   : > { %6414 = vrcp.f32 %v2312_v44 }
 0xdd4   : > { %v2315_v45 = vpop.xlane.xlu0 %2314 }
 0xdd5   : > { %6416 = vrcp.f32 %v2315_v45 }
 0xdd8   : > { %v2473_v54 = vpop.permute.xlu0 %2472 }
 0xddb   : > { %v6415_v48 = vpop.eup %6414 }
 0xddc   : > { %v2318_v50 = vmul.f32 %v6415_v48, %v6411_v40 }
 0xdde   : > { %6107 = vmatmul.mubr.msk.f32.vlgmr.msra.gmra.mrb[24].mxu1 %vm637_vm4, %v2318_v50 }
 0xddf   : > { %v6417_v51 = vpop.eup %6416  ;;  %6115 = vmatpush3.xpose.msk.msra.mxu1 %vm483_vm3, %v2475_v46  ;;  %6116 = vmatprep.mubr.msk.f32.mxu1 %vm6453_vm1, %v6452_v3 }
 0xde0   : > { %v2319_v53 = vmul.f32 %v6417_v51, %v6413_v42  ;;  %6124 = vmatprep.subr.mxu1 %v6452_v3 }
 0xde2   : > { %6112 = vmatmul.mubr.msk.f32.vlgmr.msra.gmra.mrb[24].mxu0 %vm637_vm4, %v2319_v53  ;;  %6117 = vmatmul.mubr.msk.f32.vlgmr.msra.gmra.mrb[26].mxu1 %vm483_vm3, %v2473_v54 }
 0xde3   : > { %6120 = vmatpush3.xpose.msk.msra.mxu0 %vm483_vm3, %v2553_v52  ;;  %6121 = vmatprep.mubr.msk.f32.mxu0 %vm6453_vm1, %v6452_v3 }
 0xde4   : > { %6129 = vmatprep.subr.mxu0 %v6452_v3  ;;  %6126 = vmatprep.mubr.msk.f32.mxu1 %vm6453_vm1, %v6452_v3 }
 0xde6   : > { %6122 = vmatmul.mubr.msk.f32.vlgmr.msra.gmra.mrb[26].mxu0 %vm483_vm3, %v2551_v55 }
 0xde7   : > { %6131 = vmatprep.mubr.msk.f32.mxu0 %vm6453_vm1, %v6452_v3 }
 0xeb1   : > { %v6824_v56 = vpop.f32.mrb[24].mxu1 }
 0xeb2   : > { %v6108_v58 = vpop.f32.mrb[25].mxu1 }
 0xeb5   : > { %v6826_v60 = vpop.f32.mrb[24].mxu0  ;;  %v2546_v62 = vpop.f32.mrb[26].mxu1 }
 0xeb6   : > { %v6223_v63 = vpack.i.bf16 %v6826_v60, %v6824_v56  ;;  %v2628_v0 = vmul.f32 0.5, %v2546_v62  ;;  %v6113_v1 = vpop.f32.mrb[25].mxu0  ;;  %v6118_v2 = vpop.f32.mrb[27].mxu1 }
 0xeb8   : > { %v2630_v4 = vsel %vm637_vm4, %v2628_v0, -inf }
 0xeb9   : > { %2631 = vmax.xlane.f32.xlu0 %v2630_v4  ;;  %v2624_v5 = vpop.f32.mrb[26].mxu0 }
 0xeba   : > { %v2629_v6 = vmul.f32 0.5, %v2624_v5  ;;  %v6123_v7 = vpop.f32.mrb[27].mxu0 }
 0xebc   : > { %v2633_v8 = vsel %vm637_vm4, %v2629_v6, -inf }
 0xebd   : > { %2634 = vmax.xlane.f32.xlu1 %v2633_v8 }
 0xece   : > { %2652 = vrot.lane.b32.xlu1 %v6610_v10, %s6473_s20 }
 0xecf   : > { %2728 = vrot.lane.b32.xlu0 %v6613_v14, %s6473_s20 }
 0xed2   : > { %2806 = vrot.lane.b32.xlu1 %v6610_v10, %s6474_s19 }
 0xed6   : > { %2884 = vrot.lane.b32.xlu1 %v6613_v14, %s6474_s19 }
 0xeda   : > { %2882 = vrot.lane.b32.xlu1 %v6613_v14, %s6475_s21 }
 0xf46   : > { %v2632_v9 = vpop.xlane.xlu0 %2631 }
 0xf47   : > { %v2636_v11 = vsub.f32 %v2628_v0, %v2632_v9 }
 0xf49   : > { %v2638_v13 = vmul.f32 1.442695, %v2636_v11 }
 0xf4a   : > { %v2729_v16 = vpop.permute.xlu0 %2728  ;;  %v2635_v18 = vpop.xlane.xlu1 %2634 }
 0xf4b   : > { %6418 = vpow2.f32 %v2638_v13  ;;  %v2637_v19 = vsub.f32 %v2629_v6, %v2635_v18  ;;  %6130 = vmatpush3.msra.mxu0 %v2729_v16 }
 0xf4c   : > { %6139 = vmatprep.subr.mxu0 %v6452_v3 }
 0xf4d   : > { %v2640_v21 = vmul.f32 1.442695, %v2637_v19 }
 0xf4e   : > { %v2653_v23 = vpop.permute.xlu1 %2652 }
 0xf4f   : > { %6420 = vpow2.f32 %v2640_v21  ;;  %6125 = vmatpush3.msra.mxu1 %v2653_v23 }
 0xf50   : > { %6134 = vmatprep.subr.mxu1 %v6452_v3 }
 0xf52   : > { %v2807_v31 = vpop.permute.xlu1 %2806 }
 0xf55   : > { %v6419_v25 = vpop.eup %6418 }
 0xf56   : > { %v2642_v26 = vsel %vm637_vm4, %v6419_v25, 0.0  ;;  %v2885_v37 = vpop.permute.xlu1 %2884 }
 0xf57   : > { %2643 = vadd.xlane.f32.xlu0 %v2642_v26 }
 0xf59   : > { %v6421_v27 = vpop.eup %6420 }
 0xf5a   : > { %v2645_v28 = vsel %vm637_vm4, %v6421_v27, 0.0  ;;  %v2883_v41 = vpop.permute.xlu1 %2882 }
 0xf5b   : > { %2646 = vadd.xlane.f32.xlu0 %v2645_v28 }
 0xf71   : > { %2804 = vrot.lane.b32.xlu0 %v6610_v10, %s6475_s21 }
 0xfe4   : > { %v2644_v29 = vpop.xlane.xlu0 %2643 }
 0xfe5   : > { %6422 = vrcp.f32 %v2644_v29 }
 0xfe8   : > { %v2647_v30 = vpop.xlane.xlu0 %2646 }
 0xfe9   : > { %6424 = vrcp.f32 %v2647_v30 }
 0xfec   : > { %v2805_v40 = vpop.permute.xlu0 %2804 }
 0xfef   : > { %v6423_v32 = vpop.eup %6422 }
 0xff0   : > { %v2650_v33 = vmul.f32 %v6423_v32, %v6419_v25 }
 0xff2   : > { %6127 = vmatmul.mubr.msk.f32.vlgmr.msra.gmra.mrb[28].mxu1 %vm637_vm4, %v2650_v33 }
 0xff3   : > { %v6425_v35 = vpop.eup %6424  ;;  %6135 = vmatpush3.xpose.msk.msra.mxu1 %vm483_vm3, %v2807_v31  ;;  %6136 = vmatprep.mubr.msk.f32.mxu1 %vm6453_vm1, %v6452_v3 }
 0xff4   : > { %v2651_v39 = vmul.f32 %v6425_v35, %v6421_v27  ;;  %6144 = vmatprep.subr.mxu1 %v6452_v3 }
 0xff6   : > { %6132 = vmatmul.mubr.msk.f32.vlgmr.msra.gmra.mrb[28].mxu0 %vm637_vm4, %v2651_v39  ;;  %6137 = vmatmul.mubr.msk.f32.vlgmr.msra.gmra.mrb[30].mxu1 %vm483_vm3, %v2805_v40 }
 0xff7   : > { %6140 = vmatpush3.xpose.msk.msra.mxu0 %vm483_vm3, %v2885_v37  ;;  %6141 = vmatprep.mubr.msk.f32.mxu0 %vm6453_vm1, %v6452_v3 }
 0xff8   : > { %6149 = vmatprep.subr.mxu0 %v6452_v3  ;;  %6146 = vmatprep.mubr.msk.f32.mxu1 %vm6453_vm1, %v6452_v3 }
 0xffa   : > { %6142 = vmatmul.mubr.msk.f32.vlgmr.msra.gmra.mrb[30].mxu0 %vm483_vm3, %v2883_v41 }
 0xffb   : > { %6151 = vmatprep.mubr.msk.f32.mxu0 %vm6453_vm1, %v6452_v3 }
0x10c5   : > { %v2724_v42 = vpop.f32.mrb[28].mxu1 }
0x10c6   : > { %v6128_v43 = vpop.f32.mrb[29].mxu1 }
0x10c9   : > { %v2800_v44 = vpop.f32.mrb[28].mxu0  ;;  %v2878_v45 = vpop.f32.mrb[30].mxu1 }
0x10ca   : > { %v6228_v46 = vpack.i.bf16 %v2800_v44, %v2724_v42  ;;  %v2960_v48 = vmul.f32 0.5, %v2878_v45  ;;  %v6133_v50 = vpop.f32.mrb[29].mxu0  ;;  %v6138_v51 = vpop.f32.mrb[31].mxu1 }
0x10cc   : > { %v2962_v52 = vsel %vm637_vm4, %v2960_v48, -inf }
0x10cd   : > { %2963 = vmax.xlane.f32.xlu0 %v2962_v52  ;;  %v2956_v53 = vpop.f32.mrb[30].mxu0 }
0x10ce   : > { %v2961_v54 = vmul.f32 0.5, %v2956_v53  ;;  %v6143_v55 = vpop.f32.mrb[31].mxu0 }
0x10d0   : > { %v2965_v58 = vsel %vm637_vm4, %v2961_v54, -inf }
0x10d1   : > { %2966 = vmax.xlane.f32.xlu1 %v2965_v58 }
0x10e2   : > { %2984 = vrot.lane.b32.xlu1 %v6610_v10, %s6476_s23 }
0x10e6   : > { %6204 = vrot.lane.b32.xlu1 %v6203_v24, %s6477_s30 }
0x10ea   : > { %6209 = vrot.lane.b32.xlu1 %v6208_v61, %s6478_s24 }
0x10ee   : > { %6219 = vrot.lane.b32.xlu1 %v6218_v17, %s6479_s26 }
0x10f2   : > { %6229 = vrot.lane.b32.xlu1 %v6228_v46, %s6480_s28 }
0x115a   : > { %v2964_v62 = vpop.xlane.xlu0 %2963 }
0x115b   : > { %v2968_v0 = vsub.f32 %v2960_v48, %v2964_v62 }
0x115d   : > { %v2970_v10 = vmul.f32 1.442695, %v2968_v0 }
0x115e   : > { %v2967_v1 = vpop.xlane.xlu1 %2966 }
0x115f   : > { %6426 = vpow2.f32 %v2970_v10  ;;  %v2969_v2 = vsub.f32 %v2961_v54, %v2967_v1  ;;  %v5557_v54 = vld [vmem:[%s6558_s22] ss:$0 sm:$0xff] }
0x1161   : > { %v2972_v20 = vmul.f32 1.442695, %v2969_v2  ;;  %v6442_v2 = vld [vmem:[%s7203_s8] sm:$0xff] }
0x1162   : > { %v2985_v22 = vpop.permute.xlu1 %2984 }
0x1163   : > { %6428 = vpow2.f32 %v2972_v20  ;;  %6145 = vmatpush3.msra.mxu1 %v2985_v22 }
0x1164   : > { %6154 = vmatprep.subr.bf16.mxu1 %v6452_v3 }
0x1166   : > { %v6205_v8 = vpop.permute.xlu1 %6204 }
0x1167   : > { %v6207_v13 = vunpack.i.h.bf16 %v6205_v8  ;;  %v6206_v16 = vunpack.i.l.bf16 %v6205_v8 }
0x1169   : > { %v6427_v24 = vpop.eup %6426  ;;  %v3193_v26 = vsel %vm483_vm3, %v6658_v49, %v6207_v13  ;;  %v3192_v27 = vsel %vm483_vm3, %v6656_v47, %v6206_v16  ;;  %v3337_v13 = vld [vmem:[%s6563_s25 + $0x80] sm:$0xff] }
0x116a   : > { %v2974_v57 = vsel %vm637_vm4, %v6427_v24, 0.0  ;;  %v6210_v9 = vpop.permute.xlu1 %6209  ;;  %v3345_v16 = vld [vmem:[%s6563_s25 + $0xc0] sm:$0xff] }
0x116b   : > { %2975 = vadd.xlane.f32.xlu0 %v2974_v57  ;;  %v6212_v18 = vunpack.i.h.bf16 %v6210_v9  ;;  %v6211_v19 = vunpack.i.l.bf16 %v6210_v9 }
0x116d   : > { %v6429_v59 = vpop.eup %6428  ;;  %v3194_v28 = vsel %vm637_vm4, %v3192_v27, %v6211_v19  ;;  %v3195_v29 = vsel %vm637_vm4, %v3193_v26, %v6212_v18  ;;  %v3338_v18 = vld [vmem:[%s6563_s25 + $0x88] sm:$0xff]  ;;  %v5580_v19 = vcombine.high %v3337_v13, %v3345_v16  ;;  %v3323_v26 = vld [vmem:[%s6563_s25 + $0x10] sm:$0xff] }
0x116e   : > { %v2977_v61 = vsel %vm637_vm4, %v6429_v59, 0.0  ;;  %v6220_v21 = vpop.permute.xlu1 %6219  ;;  %v3331_v27 = vld [vmem:[%s6563_s25 + $0x50] sm:$0xff] }
0x116f   : > { %2978 = vadd.xlane.f32.xlu0 %v2977_v61  ;;  %v6222_v35 = vunpack.i.h.bf16 %v6220_v21  ;;  %v6221_v37 = vunpack.i.l.bf16 %v6220_v21  ;;  %v3346_v21 = vld [vmem:[%s6563_s25 + $0xc8] sm:$0xff] }
0x1172   : > { %v6230_v39 = vpop.permute.xlu1 %6229 }
0x1173   : > { %v6232_v47 = vunpack.i.h.bf16 %v6230_v39  ;;  %v6231_v43 = vunpack.i.l.bf16 %v6230_v39 }
0x1185   : > { %3060 = vrot.lane.b32.xlu0 %v6613_v14, %s6476_s23 }
0x1189   : > { %6214 = vrot.lane.b32.xlu0 %v6213_v38, %s6481_s9  ;;  %v6241_v38 = vld [vmem:[%s6551_s17 + $0x8] sm:$0xff]  }
0x118d   : > { %6224 = vrot.lane.b32.xlu0 %v6223_v63, %s6482_s12 }
0x11f8   : > { %v2976_v12 = vpop.xlane.xlu0 %2975 }
0x11f9   : > { %6430 = vrcp.f32 %v2976_v12 }
0x11fc   : > { %v2979_v15 = vpop.xlane.xlu0 %2978 }
0x11fd   : > { %6432 = vrcp.f32 %v2979_v15 }
0x1200   : > { %v3061_v17 = vpop.permute.xlu0 %3060 }
0x1201   : > { %6150 = vmatpush3.msra.mxu0 %v3061_v17 }
0x1203   : > { %v6431_v4 = vpop.eup %6430 }
0x1204   : > { %v2982_v14 = vmul.f32 %v6431_v4, %v6427_v24  ;;  %v6215_v11 = vpop.permute.xlu0 %6214  ;;  %v6443_v24 = vld [vmem:[%s7203_s8 + $0x8] sm:$0xff] }
0x1205   : > { %v6217_v23 = vunpack.i.h.bf16 %v6215_v11  ;;  %v6216_v25 = vunpack.i.l.bf16 %v6215_v11 }
0x1206   : > { %6147 = vmatmul.mubr.msk.f32.vlgmr.msra.gmra.mrb[32].mxu1 %vm637_vm4, %v2982_v14 }
0x1207   : > { %v6433_v5 = vpop.eup %6432  ;;  %6158 = vmatprep.mubr.msk.bf16.mxu1 %vm6453_vm1, %v6452_v3  ;;  %6155 = vmatpush3.bf16.msra.mxu1 %v6240_v36  ;;  %v3197_v30 = vsel %vm3196_vm5, %v3194_v28, %v6216_v25  ;;  %v3198_v31 = vsel %vm3196_vm5, %v3195_v29, %v6217_v23  ;;  %v5579_v23 = vcombine.low %v3337_v13, %v3345_v16  ;;  %v3324_v28 = vld [vmem:[%s6563_s25 + $0x18] sm:$0xff]  ;;  %v6484_v29 = vmov 0   ;;  %v3343_v13 = vld [vmem:[%s6563_s25 + $0xb0] sm:$0xff] }
0x1208   : > { %v2983_v34 = vmul.f32 %v6433_v5, %v6429_v59  ;;  %6156 = vmatprep.subr.bf16.mxu1 %v6452_v3  ;;  %v6225_v3 = vpop.permute.xlu0 %6224  ;;  %v3200_v40 = vsel %vm3199_vm6, %v3197_v30, %v6221_v37  ;;  %v3201_v41 = vsel %vm3199_vm6, %v3198_v31, %v6222_v35  ;;  %v5581_v25 = vcombine.low %v3338_v18, %v3346_v21  ;;  %v3332_v31 = vld [vmem:[%s6563_s25 + $0x58] sm:$0xff]  ;;  %v3351_v16 = vld [vmem:[%s6563_s25 + $0xf0] sm:$0xff] }
0x1209   : > { %v6227_v32 = vunpack.i.h.bf16 %v6225_v3  ;;  %v6226_v33 = vunpack.i.l.bf16 %v6225_v3  ;;  %v5582_v3 = vcombine.high %v3338_v18, %v3346_v21  ;;  %v5568_v30 = vcombine.high %v3323_v26, %v3331_v27  ;;  %v3344_v18 = vld [vmem:[%s6563_s25 + $0xb8] sm:$0xff] }
0x120a   : > { %6152 = vmatmul.mubr.msk.f32.vlgmr.msra.gmra.mrb[32].mxu0 %vm637_vm4, %v2983_v34  ;;  %v5570_v35 = vcombine.high %v3324_v28, %v3332_v31 }
0x120b   : > { %6157 = vmatpush3.bf16.msra.mxu1 %v6241_v38  ;;  %v3203_v49 = vsel %vm3202_vm7, %v3200_v40, %v6226_v33  ;;  %v3204_v42 = vsel %vm3202_vm7, %v3201_v41, %v6227_v32  ;;  %3632 = vmatprep.mubr.bf16.mxu0 %v6484_v29  ;;  %v5567_v32 = vcombine.low %v3323_v26, %v3331_v27 }
0x120c   : > { %v3206_v48 = vsel %vm3205_vm8, %v3203_v49, %v6231_v43  ;;  %v3207_v50 = vsel %vm3205_vm8, %v3204_v42, %v6232_v47  ;;  %v5569_v33 = vcombine.low %v3324_v28, %v3332_v31  ;;  %v5561_v43 = vld [vmem:[%s6558_s22 + $0x1] ss:$0 sm:$0xff]  ;;  %v5591_v26 = vcombine.low %v3343_v13, %v3351_v16 }
0x120d   : > { %v6242_v28 = vld [vmem:[%s6574_s16 + $0x40] sm:$0xff]  }
0x120e   : > { %v6244_v31 = vld [vmem:[%s6574_s16] sm:$0xff]  }
0x12d9   : > { %v3056_v56 = vpop.f32.mrb[32].mxu1 }
0x12da   : > { %v6148_v60 = vpop.f32.mrb[33].mxu1 }
0x12db   : > { %v3329_v60 = vld [vmem:[%s6563_s25 + $0x40] sm:$0xff] }
0x12dd   : > { %v3132_v63 = vpop.f32.mrb[32].mxu0 }
0x12de   : > { %v6233_v6 = vpack.i.bf16 %v3132_v63, %v3056_v56  ;;  %v6153_v7 = vpop.f32.mrb[33].mxu0  ;;  %v3321_v56 = vld [vmem:[%s6563_s25] sm:$0xff]  ;;  %v3322_v63 = vld [vmem:[%s6563_s25 + $0x8] sm:$0xff] }
0x12df   : > { %v3330_v7 = vld [vmem:[%s6563_s25 + $0x48] sm:$0xff]  ;;  %v5563_v8 = vcombine.low %v3321_v56, %v3329_v60 }
0x12e0   : > { %6234 = vrot.lane.b32.xlu0 %v6233_v6, %s6483_s13  ;;  %v5564_v6 = vcombine.high %v3321_v56, %v3329_v60  ;;  %v5565_v9 = vcombine.low %v3322_v63, %v3330_v7  ;;  %v5566_v11 = vcombine.high %v3322_v63, %v3330_v7  ;;  %v3327_v56 = vld [vmem:[%s6563_s25 + $0x30] sm:$0xff]  ;;  %v3328_v63 = vld [vmem:[%s6563_s25 + $0x38] sm:$0xff] }
0x12e1   : > { %v3335_v60 = vld [vmem:[%s6563_s25 + $0x70] sm:$0xff] }
0x12e2   : > { %3600 = vmatprep.subr.bf16.mxu0 %v5564_v6  ;;  %3643 = vmatprep.subr.bf16.mxu1 %v5566_v11  ;;  %v3336_v6 = vld [vmem:[%s6563_s25 + $0x78] sm:$0xff]  ;;  %v5575_v21 = vcombine.low %v3327_v56, %v3335_v60 }
0x12e3   : > { %3601 = vmatpush1.bf16.msra.mxu0 %v5563_v8  ;;  %v5578_v11 = vcombine.high %v3328_v63, %v3336_v6 }
0x12e4   : > { %3602 = vmatprep.subr.bf16.mxu0 %v5580_v19  ;;  %v3352_v19 = vld [vmem:[%s6563_s25 + $0xf8] sm:$0xff] }
0x12e5   : > { %v5593_v27 = vcombine.low %v3344_v18, %v3352_v19 }
0x12e7   : > { %3603 = vmatpush1.bf16.msra.mxu0 %v5579_v23  ;;  %v5577_v23 = vcombine.low %v3328_v63, %v3336_v6 }
0x12e8   : > { %3686 = vmatprep.subr.bf16.mxu0 %v5568_v30  ;;  %v6243_v30 = vld [vmem:[%s6574_s16 + $0xc0] sm:$0xff]  }
0x1352   : > { %v6235_v44 = vpop.permute.xlu0 %6234 }
0x1353   : > { %v6237_v45 = vunpack.i.h.bf16 %v6235_v44  ;;  %v6236_v46 = vunpack.i.l.bf16 %v6235_v44 }
0x1355   : > { %v3210_v51 = vsel %vm3208_vm9, %v3207_v50, %v6237_v45  ;;  %v3209_v52 = vsel %vm3208_vm9, %v3206_v48, %v6236_v46  ;;  %v5562_v50 = vld [vmem:[%s6558_s22 + $0x2] ss:$0 sm:$0xff] }
0x1356   : > { %v3211_v53 = vpack.c.bf16 %v3210_v51, %v3209_v52  ;;  %v3339_v52 = vld [vmem:[%s6563_s25 + $0x90] sm:$0xff] }
0x1358   : > { %6159 = vmatmul.mubr.msk.bf16.vlgmr.msra.gmra.mrb[36].mxu1 %vm435_vm2, %v3211_v53  ;;  %v3347_v53 = vld [vmem:[%s6563_s25 + $0xd0] sm:$0xff] }
0x1359   : > { %3644 = vmatpush1.bf16.msra.mxu1 %v5565_v9  ;;  %3675 = vmatprep.mubr.bf16.mxu1 %v6484_v29  ;;  %v5576_v9 = vcombine.high %v3327_v56, %v3335_v60 }
0x135a   : > { %3645 = vmatprep.subr.bf16.mxu1 %v5582_v3  ;;  %v5594_v3 = vcombine.high %v3344_v18, %v3352_v19 }
0x135d   : > { %3646 = vmatpush1.bf16.msra.mxu1 %v5581_v25  ;;  %v5592_v25 = vcombine.high %v3343_v13, %v3351_v16 }
0x135e   : > { %3729 = vmatprep.subr.bf16.mxu1 %v5570_v35  ;;  %v6247_v35 = vld [vmem:[%s6574_s16 + $0xc8] sm:$0xff]  }
0x142b   : > { %v3270_v55 = vpop.f32.mrb[36].mxu1 }
0x142c   : > { %v3271_v58 = vadd.f32 %v5557_v54, %v3270_v55  ;;  %v6160_v62 = vpop.f32.mrb[37].mxu1  ;;  %v3348_v55 = vld [vmem:[%s6563_s25 + $0xd8] sm:$0xff] }
0x142d   : > { %v3273_v0 = vpop.f32.mrb[38].mxu1 }
0x142e   : > { %v3274_v10 = vadd.f32 %v5557_v54, %v3273_v0  ;;  %v6161_v1 = vpop.f32.mrb[39].mxu1  ;;  %v3277_v20 = vadd.f32 %v6442_v2, %v3271_v58  ;;  %v3340_v54 = vld [vmem:[%s6563_s25 + $0x98] sm:$0xff]  ;;  %v3325_v2 = vld [vmem:[%s6563_s25 + $0x20] sm:$0xff] }
0x142f   : > { %v5586_v1 = vcombine.high %v3340_v54, %v3348_v55 }
0x1430   : > { %v3281_v22 = vsel %vm435_vm2, %v3277_v20, 0.0  ;;  %v3278_v57 = vadd.f32 %v6443_v24, %v3274_v10  ;;  %v5584_v10 = vcombine.high %v3339_v52, %v3347_v53  ;;  %v3334_v24 = vld [vmem:[%s6563_s25 + $0x68] sm:$0xff] }
0x1431   : > { %3282 = vadd.xlane.f32.xlu1 %v3281_v22  ;;  %v3326_v22 = vld [vmem:[%s6563_s25 + $0x28] sm:$0xff] }
0x1432   : > { %v3284_v59 = vsel %vm435_vm2, %v3278_v57, 0.0 }
0x1433   : > { %3285 = vadd.xlane.f32.xlu0 %v3284_v59  ;;  %v5585_v59 = vcombine.low %v3340_v54, %v3348_v55  ;;  %v6265_v54 = vld [vmem:[%s6574_s16 + $0xa8] sm:$0xff]   ;;  %v6266_v55 = vld [vmem:[%s6574_s16 + $0x70] sm:$0xff]  }
0x14be   : > { %v3283_v61 = vpop.xlane.xlu1 %3282 }
0x14bf   : > { %v3288_v12 = vmul.f32 0.03125, %v3283_v61 }
0x14c0   : > { %v3286_v15 = vpop.xlane.xlu0 %3285 }
0x14c1   : > { %v3290_v17 = vsub.f32 %v3277_v20, %v3288_v12  ;;  %v3289_v4 = vmul.f32 0.03125, %v3286_v15  ;;  %v3333_v20 = vld [vmem:[%s6563_s25 + $0x60] sm:$0xff]  ;;  %v5574_v12 = vcombine.high %v3326_v22, %v3334_v24 }
0x14c2   : > { %v5572_v61 = vcombine.high %v3325_v2, %v3333_v20  ;;  %v3341_v15 = vld [vmem:[%s6563_s25 + $0xa0] sm:$0xff] }
0x14c3   : > { %v3291_v14 = vsub.f32 %v3278_v57, %v3289_v4  ;;  %v3292_v5 = vmul.f32 %v3290_v17, %v3290_v17  ;;  %v5583_v57 = vcombine.low %v3339_v52, %v3347_v53  ;;  %v3342_v4 = vld [vmem:[%s6563_s25 + $0xa8] sm:$0xff] }
0x14c4   : > { %v6263_v52 = vld [vmem:[%s6574_s16 + $0xe8] sm:$0xff]  }
0x14c5   : > { %v3294_v34 = vsel %vm435_vm2, %v3292_v5, 0.0  ;;  %v3293_v36 = vmul.f32 %v3291_v14, %v3291_v14  ;;  %v5571_v5 = vcombine.low %v3325_v2, %v3333_v20  ;;  %v6264_v53 = vld [vmem:[%s6574_s16 + $0x28] sm:$0xff]   ;;  %v6270_v2 = vld [vmem:[%s6574_s16 + $0x78] sm:$0xff]  }
0x14c6   : > { %3295 = vadd.xlane.f32.xlu0 %v3294_v34  ;;  %v5573_v34 = vcombine.low %v3326_v22, %v3334_v24  ;;  %v6271_v20 = vld [vmem:[%s6574_s16 + $0xf8] sm:$0xff]  }
0x14c7   : > { %v3297_v38 = vsel %vm435_vm2, %v3293_v36, 0.0  ;;  %v6272_v22 = vld [vmem:[%s6574_s16 + $0x38] sm:$0xff]  }
0x14c8   : > { %3298 = vadd.xlane.f32.xlu1 %v3297_v38  ;;  %v6273_v24 = vld [vmem:[%s6574_s16 + $0xb8] sm:$0xff]  }
0x1553   : > { %v3296_v37 = vpop.xlane.xlu0 %3295 }
0x1554   : > { %v3300_v39 = vmul.f32 0.03125, %v3296_v37  ;;  %v6249_v37 = vld [vmem:[%s6574_s16 + $0x88] sm:$0xff]  }
0x1555   : > { %v3299_v40 = vpop.xlane.xlu1 %3298 }
0x1556   : > { %v3302_v41 = vadd.f32 1e-05, %v3300_v39  ;;  %v3301_v49 = vmul.f32 0.03125, %v3299_v40  ;;  %v6250_v39 = vld [vmem:[%s6574_s16 + $0x50] sm:$0xff]  }
0x1557   : > { %v6251_v40 = vld [vmem:[%s6574_s16 + $0xd0] sm:$0xff]  }
0x1558   : > { %6434 = vrsqrt.f32 %v3302_v41  ;;  %v3303_v42 = vadd.f32 1e-05, %v3301_v49  ;;  %v6252_v41 = vld [vmem:[%s6574_s16 + $0x10] sm:$0xff]  }
0x1559   : > { %v6253_v49 = vld [vmem:[%s6574_s16 + $0x90] sm:$0xff]  }
0x155a   : > { %6436 = vrsqrt.f32 %v3303_v42  ;;  %v6254_v42 = vld [vmem:[%s6574_s16 + $0x58] sm:$0xff]  }
0x1562   : > { %v6435_v47 = vpop.eup %6434 }
0x1563   : > { %v3306_v44 = vmul.f32 %v6435_v47, %v3290_v17  ;;  %v3349_v17 = vld [vmem:[%s6563_s25 + $0xe0] sm:$0xff]  ;;  %v6255_v47 = vld [vmem:[%s6574_s16 + $0xd8] sm:$0xff]  }
0x1564   : > { %v6437_v45 = vpop.eup %6436  ;;  %v5588_v36 = vcombine.high %v3341_v15, %v3349_v17  ;;  %v5587_v7 = vcombine.low %v3341_v15, %v3349_v17  ;;  %v7009_v17 = vld [vmem:[%s6568_s10 + $0x8] sm:$0xff] }
0x1565   : > { %v3312_v46 = vmul.f32 %v5561_v43, %v3306_v44  ;;  %v3307_v48 = vmul.f32 %v6437_v45, %v3291_v14  ;;  %v3350_v14 = vld [vmem:[%s6563_s25 + $0xe8] sm:$0xff]  ;;  %v6257_v44 = vld [vmem:[%s6574_s16 + $0x98] sm:$0xff]   ;;  %v6258_v45 = vld [vmem:[%s6574_s16 + $0x60] sm:$0xff]  }
0x1566   : > { %v5590_v38 = vcombine.high %v3342_v4, %v3350_v14  ;;  %v5589_v8 = vcombine.low %v3342_v4, %v3350_v14 }
0x1567   : > { %v3313_v51 = vmul.f32 %v5561_v43, %v3307_v48  ;;  %v6925_v58 = vadd.f32 %v5562_v50, %v3312_v46  ;;  %v6256_v43 = vld [vmem:[%s6574_s16 + $0x18] sm:$0xff]   ;;  %v6259_v46 = vld [vmem:[%s6574_s16 + $0xe0] sm:$0xff]  }
0x1568   : > { %v6260_v48 = vld [vmem:[%s6574_s16 + $0x20] sm:$0xff]  }
0x1569   : > { %v6927_v62 = vadd.f32 %v5562_v50, %v3313_v51  ;;  %v6261_v50 = vld [vmem:[%s6574_s16 + $0xa0] sm:$0xff]   ;;  %v6262_v51 = vld [vmem:[%s6574_s16 + $0x68] sm:$0xff]  }
0x156b   : > { %v6931_v0 = vpack.c.bf16 %v6927_v62, %v6925_v58 }
0x156d   : > { %5595 = vmatmul.mubr.msk.bf16.vlgmr.msra.gmra.mrb[36].mxu0 %vm435_vm2, %v6931_v0  ;;  %5596 = vmatmul.mubr.msk.bf16.vlgmr.msra.gmra.mrb[40].mxu1 %vm435_vm2, %v6931_v0 }
0x156e   : > { %3687 = vmatpush1.bf16.msra.mxu0 %v5567_v32  ;;  %3730 = vmatpush1.bf16.msra.mxu1 %v5569_v33  ;;  %v6245_v32 = vld [vmem:[%s6574_s16 + $0x80] sm:$0xff]   ;;  %v6246_v33 = vld [vmem:[%s6574_s16 + $0x48] sm:$0xff]  }
0x156f   : > { %3688 = vmatprep.subr.bf16.mxu0 %v5584_v10  ;;  %3731 = vmatprep.subr.bf16.mxu1 %v5586_v1  ;;  %v6268_v10 = vld [vmem:[%s6574_s16 + $0x30] sm:$0xff]  }
0x1570   : > { %3718 = vmatprep.mubr.bf16.mxu0 %v6484_v29  ;;  %3761 = vmatprep.mubr.bf16.mxu1 %v6484_v29  ;;  %v6269_v1 = vld [vmem:[%s6574_s16 + $0xb0] sm:$0xff]  }
0x1572   : > { %3689 = vmatpush1.bf16.msra.mxu0 %v5583_v57  ;;  %3732 = vmatpush1.bf16.msra.mxu1 %v5585_v59  ;;  %v6274_v57 = vld [vmem:[%s6574_s16 + $0x140] sm:$0xff]  }
0x1573   : > { %3772 = vmatprep.subr.bf16.mxu0 %v5572_v61  ;;  %3815 = vmatprep.subr.bf16.mxu1 %v5574_v12  ;;  %v6275_v59 = vld [vmem:[%s6574_s16 + $0x1c0] sm:$0xff]   ;;  %v3357_v61 = vlaneseq }
0x1575   : > { %5597 = vmatmul.mubr.msk.bf16.vlgmr.msra.gmra.mrb[40].mxu0 %vm435_vm2, %v6931_v0  ;;  %5598 = vmatmul.mubr.msk.bf16.vlgmr.msra.gmra.mrb[44].mxu1 %vm435_vm2, %v6931_v0  ;;  %v7005_v12 = vshrl.u32 %v3357_v61, 7 }
0x1576   : > { %3773 = vmatpush1.bf16.msra.mxu0 %v5571_v5  ;;  %3816 = vmatpush1.bf16.msra.mxu1 %v5573_v34  ;;  %v3353_v34 = vld [vmem:[%s6568_s10] sm:$0xff] }
0x1577   : > { %3774 = vmatprep.subr.bf16.mxu0 %v5588_v36  ;;  %3817 = vmatprep.subr.bf16.mxu1 %v5590_v38  ;;  %v3383_v15 = vsub.s32 6, %v7005_v12  ;;  %v3359_v14 = vsub.s32 0, %v7005_v12  ;;  %v3367_v5 = vsub.s32 2, %v7005_v12  ;;  %v3363_v36 = vsub.s32 1, %v7005_v12 }
0x1578   : > { %3804 = vmatprep.mubr.bf16.mxu0 %v6484_v29  ;;  %3847 = vmatprep.mubr.bf16.mxu1 %v6484_v29  ;;  %v3371_v38 = vsub.s32 3, %v7005_v12  ;;  %v3387_v13 = vsub.s32 7, %v7005_v12 }
0x1579   : > { %v7012_v4 = vrot.slane %v7009_v17, %v3383_v15  ;;  %v3360_v56 = vrot.slane %v3353_v34, %v3359_v14  ;;  %v3368_v60 = vrot.slane %v3353_v34, %v3367_v5  ;;  %v3364_v63 = vrot.slane %v3353_v34, %v3363_v36 }
0x157a   : > { %3775 = vmatpush1.bf16.msra.mxu0 %v5587_v7  ;;  %3818 = vmatpush1.bf16.msra.mxu1 %v5589_v8  ;;  %v3372_v6 = vrot.slane %v3353_v34, %v3371_v38  ;;  %v3375_v7 = vsub.s32 4, %v7005_v12 }
0x157b   : > { %3858 = vmatprep.subr.bf16.mxu0 %v5576_v9  ;;  %3901 = vmatprep.subr.bf16.mxu1 %v5578_v11  ;;  %v3379_v11 = vsub.s32 5, %v7005_v12 }
0x157d   : > { %5599 = vmatmul.mubr.msk.bf16.vlgmr.msra.gmra.mrb[44].mxu0 %vm435_vm2, %v6931_v0  ;;  %5600 = vmatmul.mubr.msk.bf16.vlgmr.msra.gmra.mrb[48].mxu1 %vm435_vm2, %v6931_v0 }
0x157e   : > { %3859 = vmatpush1.bf16.msra.mxu0 %v5575_v21  ;;  %3902 = vmatpush1.bf16.msra.mxu1 %v5577_v23 }
0x157f   : > { %3860 = vmatprep.subr.bf16.mxu0 %v5592_v25  ;;  %3903 = vmatprep.subr.bf16.mxu1 %v5594_v3 }
0x1580   : > { %3890 = vmatprep.mubr.bf16.mxu0 %v6484_v29  ;;  %3933 = vmatprep.mubr.bf16.mxu1 %v6484_v29  ;;  %v6248_v29 = vld [vmem:[%s6574_s16 + $0x8] sm:$0xff]  }
0x1582   : > { %3861 = vmatpush1.bf16.msra.mxu0 %v5591_v26  ;;  %3904 = vmatpush1.bf16.msra.mxu1 %v5593_v27 }
0x1583   : > { %5810 = vmatprep.subr.bf16.mxu0 %v6242_v28  ;;  %5832 = vmatprep.subr.bf16.mxu1 %v6243_v30 }
0x1585   : > { %5601 = vmatmul.mubr.msk.bf16.vlgmr.msra.gmra.mrb[48].mxu0 %vm435_vm2, %v6931_v0  ;;  %5602 = vmatmul.mubr.msk.bf16.vlgmr.msra.gmra.mrb[52].mxu1 %vm435_vm2, %v6931_v0  ;;  %v6267_v0 = vld [vmem:[%s6574_s16 + $0xf0] sm:$0xff]  }
0x1586   : > { %5811 = vmatpush3.bf16.msra.mxu0 %v6244_v31  ;;  %5833 = vmatpush3.bf16.msra.mxu1 %v6245_v32  ;;  %v3376_v32 = vrot.slane %v3353_v34, %v3375_v7 }
0x1587   : > { %5812 = vmatprep.subr.bf16.mxu0 %v6246_v33  ;;  %5834 = vmatprep.subr.bf16.mxu1 %v6247_v35  ;;  %v3384_v33 = vrot.slane %v3353_v34, %v3383_v15 }
0x158a   : > { %5813 = vmatpush3.bf16.msra.mxu0 %v6248_v29  ;;  %5835 = vmatpush3.bf16.msra.mxu1 %v6249_v37  ;;  %v3380_v37 = vrot.slane %v3353_v34, %v3379_v11 }
0x158b   : > { %5814 = vmatprep.subr.bf16.mxu0 %v6250_v39  ;;  %5836 = vmatprep.subr.bf16.mxu1 %v6251_v40  ;;  %v3388_v39 = vrot.slane %v3353_v34, %v3387_v13  ;;  %v3400_v34 = vrot.slane %v7009_v17, %v3367_v5  ;;  %v3404_v5 = vrot.slane %v7009_v17, %v3371_v38 }
0x158e   : > { %5815 = vmatpush3.bf16.msra.mxu0 %v6252_v41  ;;  %5837 = vmatpush3.bf16.msra.mxu1 %v6253_v49 }
0x158f   : > { %5816 = vmatprep.subr.bf16.mxu0 %v6254_v42  ;;  %5838 = vmatprep.subr.bf16.mxu1 %v6255_v47 }
0x1592   : > { %5817 = vmatpush3.bf16.msra.mxu0 %v6256_v43  ;;  %5839 = vmatpush3.bf16.msra.mxu1 %v6257_v44 }
0x1593   : > { %5818 = vmatprep.subr.bf16.mxu0 %v6258_v45  ;;  %5840 = vmatprep.subr.bf16.mxu1 %v6259_v46 }
0x1596   : > { %5819 = vmatpush3.bf16.msra.mxu0 %v6260_v48  ;;  %5841 = vmatpush3.bf16.msra.mxu1 %v6261_v50 }
0x1597   : > { %5820 = vmatprep.subr.bf16.mxu0 %v6262_v51  ;;  %5842 = vmatprep.subr.bf16.mxu1 %v6263_v52 }
0x159a   : > { %5821 = vmatpush3.bf16.msra.mxu0 %v6264_v53  ;;  %5843 = vmatpush3.bf16.msra.mxu1 %v6265_v54  ;;  %v6276_v54 = vld [vmem:[%s6574_s16 + $0x100] sm:$0xff]  }
0x159b   : > { %5822 = vmatprep.subr.bf16.mxu0 %v6266_v55  ;;  %5844 = vmatprep.subr.bf16.mxu1 %v6267_v0  ;;  %v6277_v55 = vld [vmem:[%s6574_s16 + $0x180] sm:$0xff]  }
0x159e   : > { %5823 = vmatpush3.bf16.msra.mxu0 %v6268_v10  ;;  %5845 = vmatpush3.bf16.msra.mxu1 %v6269_v1 }
0x159f   : > { %5824 = vmatprep.subr.bf16.mxu0 %v6270_v2  ;;  %5846 = vmatprep.subr.bf16.mxu1 %v6271_v20  ;;  %v6278_v20 = vld [vmem:[%s6574_s16 + $0x148] sm:$0xff]  }
0x15a2   : > { %5825 = vmatpush3.bf16.msra.mxu0 %v6272_v22  ;;  %5847 = vmatpush3.bf16.msra.mxu1 %v6273_v24  ;;  %v6279_v22 = vld [vmem:[%s6574_s16 + $0x1c8] sm:$0xff]   ;;  %v3392_v24 = vrot.slane %v7009_v17, %v3359_v14  ;;  %v3396_v14 = vrot.slane %v7009_v17, %v3363_v36  ;;  %v6283_v36 = vld [vmem:[%s6574_s16 + $0x1d0] sm:$0xff]  }
0x15a3   : > { %5854 = vmatprep.subr.bf16.mxu0 %v6274_v57  ;;  %5876 = vmatprep.subr.bf16.mxu1 %v6275_v59 }
0x1640   : > { %v3634_v8 = vpop.f32.mrb[36].mxu0  ;;  %v3677_v9 = vpop.f32.mrb[40].mxu1 }
0x1641   : > { %v3635_v16 = vadd.f32 %v3634_v8, %v3360_v56  ;;  %v3678_v18 = vadd.f32 %v3677_v9, %v3368_v60  ;;  %v3636_v19 = vpop.f32.mrb[37].mxu0  ;;  %v3679_v21 = vpop.f32.mrb[41].mxu1 }
0x1642   : > { %v3637_v23 = vadd.f32 %v3636_v19, %v3364_v63  ;;  %v3680_v25 = vadd.f32 %v3679_v21, %v3372_v6  ;;  %v3638_v3 = vpop.f32.mrb[38].mxu0  ;;  %v3681_v26 = vpop.f32.mrb[42].mxu1 }
0x1643   : > { %v3639_v27 = vadd.f32 %v3638_v3, %v3360_v56  ;;  %v3682_v28 = vadd.f32 %v3681_v26, %v3368_v60  ;;  %v3640_v30 = vpop.f32.mrb[39].mxu0  ;;  %v3683_v31 = vpop.f32.mrb[43].mxu1  ;;  %v3944_v40 = vmax.f32 %v3635_v16, 0.0  ;;  %v3946_v41 = vmax.f32 %v3678_v18, 0.0  ;;  %v6280_v16 = vld [vmem:[%s6574_s16 + $0x108] sm:$0xff]   ;;  %v6282_v3 = vld [vmem:[%s6574_s16 + $0x150] sm:$0xff]  }
0x1644   : > { %v3641_v35 = vadd.f32 %v3640_v30, %v3364_v63  ;;  %v3684_v29 = vadd.f32 %v3683_v31, %v3372_v6  ;;  %v3945_v47 = vmax.f32 %v3637_v23, 0.0  ;;  %v3947_v43 = vmax.f32 %v3680_v25, 0.0  ;;  %v6281_v18 = vld [vmem:[%s6574_s16 + $0x188] sm:$0xff]  }
0x1645   : > { %v3960_v49 = vmax.f32 %v3639_v27, 0.0  ;;  %v3962_v42 = vmax.f32 %v3682_v28, 0.0 }
0x1646   : > { %v3961_v44 = vmax.f32 %v3641_v35, 0.0  ;;  %v3963_v45 = vmax.f32 %v3684_v29, 0.0 }
0x1647   : > { %v3976_v46 = vpack.c.bf16 %v3960_v49, %v3944_v40  ;;  %v3978_v48 = vpack.c.bf16 %v3962_v42, %v3946_v41 }
0x1648   : > { %v3977_v50 = vpack.c.bf16 %v3961_v44, %v3945_v47  ;;  %v3979_v51 = vpack.c.bf16 %v3963_v45, %v3947_v43  ;;  %v3720_v52 = vpop.f32.mrb[40].mxu0  ;;  %v3763_v53 = vpop.f32.mrb[44].mxu1  ;;  %v6286_v47 = vld [vmem:[%s6574_s16 + $0x158] sm:$0xff]  }
0x1649   : > { %v3721_v0 = vadd.f32 %v3720_v52, %v3376_v32  ;;  %v3764_v10 = vadd.f32 %v3763_v53, %v3384_v33  ;;  %v3722_v1 = vpop.f32.mrb[41].mxu0  ;;  %v3765_v2 = vpop.f32.mrb[45].mxu1  ;;  %v6287_v43 = vld [vmem:[%s6574_s16 + $0x1d8] sm:$0xff]  }
0x164a   : > { %v3723_v57 = vadd.f32 %v3722_v1, %v3380_v37  ;;  %v3766_v59 = vadd.f32 %v3765_v2, %v3388_v39  ;;  %v3724_v61 = vpop.f32.mrb[42].mxu0  ;;  %v3767_v15 = vpop.f32.mrb[46].mxu1  ;;  %5053 = vmatprep.mubr.bf16.mxu0 %v3977_v50  ;;  %5094 = vmatprep.mubr.bf16.mxu1 %v3979_v51  ;;  %v6288_v1 = vld [vmem:[%s6574_s16 + $0x118] sm:$0xff]  }
0x164b   : > { %v3725_v56 = vadd.f32 %v3724_v61, %v3376_v32  ;;  %v3768_v60 = vadd.f32 %v3767_v15, %v3384_v33  ;;  %v3726_v63 = vpop.f32.mrb[43].mxu0  ;;  %v3769_v6 = vpop.f32.mrb[47].mxu1  ;;  %5054 = vmatmul.mubr.bf16.vlgmr.msra.gmra.mrb[52].mxu0 %v3976_v46  ;;  %5095 = vmatmul.mubr.bf16.vlgmr.msra.gmra.mrb[56].mxu1 %v3978_v48  ;;  %v3948_v19 = vmax.f32 %v3721_v0, 0.0  ;;  %v3950_v21 = vmax.f32 %v3764_v10, 0.0  ;;  %v6289_v2 = vld [vmem:[%s6574_s16 + $0x198] sm:$0xff]  }
0x164c   : > { %v3727_v8 = vadd.f32 %v3726_v63, %v3380_v37  ;;  %v3770_v9 = vadd.f32 %v3769_v6, %v3388_v39  ;;  %5855 = vmatpush3.bf16.msra.mxu0 %v6276_v54  ;;  %5877 = vmatpush3.bf16.msra.mxu1 %v6277_v55  ;;  %v3949_v26 = vmax.f32 %v3723_v57, 0.0  ;;  %v3951_v27 = vmax.f32 %v3766_v59, 0.0  ;;  %v6284_v37 = vld [vmem:[%s6574_s16 + $0x110] sm:$0xff]  }
0x164d   : > { %v3964_v23 = vmax.f32 %v3725_v56, 0.0  ;;  %v3966_v25 = vmax.f32 %v3768_v60, 0.0  ;;  %5856 = vmatprep.subr.bf16.mxu0 %v6278_v20  ;;  %5878 = vmatprep.subr.bf16.mxu1 %v6279_v22  ;;  %v6285_v39 = vld [vmem:[%s6574_s16 + $0x190] sm:$0xff]   ;;  %v3408_v54 = vrot.slane %v7009_v17, %v3375_v7  ;;  %v3412_v55 = vrot.slane %v7009_v17, %v3379_v11  ;;  %v6290_v7 = vld [vmem:[%s6574_s16 + $0x160] sm:$0xff]  }
0x164e   : > { %v3965_v28 = vmax.f32 %v3727_v8, 0.0  ;;  %v3967_v30 = vmax.f32 %v3770_v9, 0.0  ;;  %v3420_v20 = vrot.slane %v7009_v17, %v3387_v13  ;;  %v6291_v11 = vld [vmem:[%s6574_s16 + $0x1e0] sm:$0xff]  }
0x164f   : > { %v7048_v31 = vpack.c.bf16 %v3964_v23, %v3948_v19  ;;  %v7050_v32 = vpack.c.bf16 %v3966_v25, %v3950_v21  ;;  %v6293_v8 = vld [vmem:[%s6574_s16 + $0x1a0] sm:$0xff]   ;;  %v6294_v19 = vld [vmem:[%s6574_s16 + $0x168] sm:$0xff]  }
0x1650   : > { %v3981_v38 = vpack.c.bf16 %v3965_v28, %v3949_v26  ;;  %v3983_v33 = vpack.c.bf16 %v3967_v30, %v3951_v27  ;;  %5857 = vmatpush3.bf16.msra.mxu0 %v6280_v16  ;;  %5879 = vmatpush3.bf16.msra.mxu1 %v6281_v18  ;;  %v3806_v35 = vpop.f32.mrb[44].mxu0  ;;  %v3849_v29 = vpop.f32.mrb[48].mxu1  ;;  %v6295_v21 = vld [vmem:[%s6574_s16 + $0x1e8] sm:$0xff]  }
0x1651   : > { %v3807_v40 = vadd.f32 %v3806_v35, %v3392_v24  ;;  %v3850_v41 = vadd.f32 %v3849_v29, %v3400_v34  ;;  %v3808_v49 = vpop.f32.mrb[45].mxu0  ;;  %v3851_v42 = vpop.f32.mrb[49].mxu1  ;;  %5858 = vmatprep.subr.bf16.mxu0 %v6282_v3  ;;  %5880 = vmatprep.subr.bf16.mxu1 %v6283_v36  ;;  %v6296_v35 = vld [vmem:[%s6574_s16 + $0x128] sm:$0xff]  }
0x1652   : > { %v3809_v44 = vadd.f32 %v3808_v49, %v3396_v14  ;;  %v3852_v45 = vadd.f32 %v3851_v42, %v3404_v5  ;;  %v3810_v46 = vpop.f32.mrb[46].mxu0  ;;  %v3853_v48 = vpop.f32.mrb[50].mxu1  ;;  %5135 = vmatprep.mubr.bf16.mxu0 %v3981_v38  ;;  %5176 = vmatprep.mubr.bf16.mxu1 %v3983_v33  ;;  %v6297_v29 = vld [vmem:[%s6574_s16 + $0x1a8] sm:$0xff]   ;;  %v6298_v49 = vld [vmem:[%s6574_s16 + $0x170] sm:$0xff]  }
0x1653   : > { %v3811_v50 = vadd.f32 %v3810_v46, %v3392_v24  ;;  %v3854_v51 = vadd.f32 %v3853_v48, %v3400_v34  ;;  %v3812_v52 = vpop.f32.mrb[47].mxu0  ;;  %v3855_v53 = vpop.f32.mrb[51].mxu1  ;;  %v3952_v22 = vmax.f32 %v3807_v40, 0.0  ;;  %v3954_v24 = vmax.f32 %v3850_v41, 0.0 }
0x1654   : > { %v3813_v0 = vadd.f32 %v3812_v52, %v3396_v14  ;;  %v3856_v10 = vadd.f32 %v3855_v53, %v3404_v5  ;;  %5859 = vmatpush3.bf16.msra.mxu0 %v6284_v37  ;;  %5881 = vmatpush3.bf16.msra.mxu1 %v6285_v39  ;;  %v3953_v61 = vmax.f32 %v3809_v44, 0.0  ;;  %v3955_v15 = vmax.f32 %v3852_v45, 0.0  ;;  %v6292_v14 = vld [vmem:[%s6574_s16 + $0x120] sm:$0xff]   ;;  %v6301_v52 = vld [vmem:[%s6574_s16 + $0x1b0] sm:$0xff]   ;;  %v6302_v53 = vld [vmem:[%s6574_s16 + $0x178] sm:$0xff]  }
0x1655   : > { %v3968_v57 = vmax.f32 %v3811_v50, 0.0  ;;  %v3970_v59 = vmax.f32 %v3854_v51, 0.0  ;;  %5860 = vmatprep.subr.bf16.mxu0 %v6286_v47  ;;  %5882 = vmatprep.subr.bf16.mxu1 %v6287_v43  ;;  %v6300_v51 = vld [vmem:[%s6574_s16 + $0x130] sm:$0xff]  }
0x1656   : > { %v3969_v34 = vmax.f32 %v3813_v0, 0.0  ;;  %v3971_v56 = vmax.f32 %v3856_v10, 0.0  ;;  %v6305_v0 = vld [vmem:[%s6574_s16 + $0x1b8] sm:$0xff]   ;;  %v6306_v10 = vld [vmem:[%s6574_s16 + $0x240] sm:$0xff]  }
0x1657   : > { %v7069_v60 = vpack.c.bf16 %v3968_v57, %v3952_v22  ;;  %v7071_v12 = vpack.c.bf16 %v3970_v59, %v3954_v24  ;;  %v6310_v22 = vld [vmem:[%s6574_s16 + $0x248] sm:$0xff]  }
0x1658   : > { %v7073_v17 = vpack.c.bf16 %v3969_v34, %v3953_v61  ;;  %v7075_v13 = vpack.c.bf16 %v3971_v56, %v3955_v15  ;;  %5861 = vmatpush3.bf16.msra.mxu0 %v6288_v1  ;;  %5883 = vmatpush3.bf16.msra.mxu1 %v6289_v2  ;;  %v3892_v63 = vpop.f32.mrb[48].mxu0  ;;  %v3935_v6 = vpop.f32.mrb[52].mxu1  ;;  %v6307_v1 = vld [vmem:[%s6574_s16 + $0x2c0] sm:$0xff]   ;;  %v6311_v24 = vld [vmem:[%s6574_s16 + $0x2c8] sm:$0xff]   ;;  %v6318_v61 = vld [vmem:[%s6574_s16 + $0x258] sm:$0xff]  }
0x1659   : > { %v3893_v9 = vadd.f32 %v3892_v63, %v3408_v54  ;;  %v3936_v16 = vadd.f32 %v3935_v6, %v7012_v4  ;;  %v3894_v18 = vpop.f32.mrb[49].mxu0  ;;  %v3937_v5 = vpop.f32.mrb[53].mxu1  ;;  %5862 = vmatprep.subr.bf16.mxu0 %v6290_v7  ;;  %5884 = vmatprep.subr.bf16.mxu1 %v6291_v11  ;;  %v6308_v2 = vld [vmem:[%s6574_s16 + $0x200] sm:$0xff]   ;;  %v6312_v57 = vld [vmem:[%s6574_s16 + $0x208] sm:$0xff]   ;;  %v6314_v7 = vld [vmem:[%s6574_s16 + $0x250] sm:$0xff]  }
0x165a   : > { %v3895_v23 = vadd.f32 %v3894_v18, %v3412_v55  ;;  %v3938_v25 = vadd.f32 %v3937_v5, %v3420_v20  ;;  %v3896_v3 = vpop.f32.mrb[50].mxu0  ;;  %v3939_v36 = vpop.f32.mrb[54].mxu1  ;;  %v6313_v59 = vld [vmem:[%s6574_s16 + $0x288] sm:$0xff]   ;;  %v6317_v11 = vld [vmem:[%s6574_s16 + $0x290] sm:$0xff]   ;;  %v6319_v15 = vld [vmem:[%s6574_s16 + $0x2d8] sm:$0xff]  }
0x165b   : > { %v3897_v26 = vadd.f32 %v3896_v3, %v3408_v54  ;;  %v3940_v27 = vadd.f32 %v3939_v36, %v7012_v4  ;;  %v3898_v28 = vpop.f32.mrb[51].mxu0  ;;  %v3941_v30 = vpop.f32.mrb[55].mxu1  ;;  %v3956_v37 = vmax.f32 %v3893_v9, 0.0  ;;  %v3958_v39 = vmax.f32 %v3936_v16, 0.0  ;;  %v6299_v4 = vld [vmem:[%s6574_s16 + $0x1f0] sm:$0xff]   ;;  %v6303_v54 = vld [vmem:[%s6574_s16 + $0x1f8] sm:$0xff]  }
0x165c   : > { %v3899_v38 = vadd.f32 %v3898_v28, %v3412_v55  ;;  %v3942_v33 = vadd.f32 %v3941_v30, %v3420_v20  ;;  %5863 = vmatpush3.bf16.msra.mxu0 %v6292_v14  ;;  %5885 = vmatpush3.bf16.msra.mxu1 %v6293_v8  ;;  %v3957_v42 = vmax.f32 %v3895_v23, 0.0  ;;  %v3959_v47 = vmax.f32 %v3938_v25, 0.0  ;;  %v6304_v55 = vld [vmem:[%s6574_s16 + $0x138] sm:$0xff]   ;;  %v6309_v20 = vld [vmem:[%s6574_s16 + $0x280] sm:$0xff]   ;;  %v6326_v14 = vld [vmem:[%s6574_s16 + $0x268] sm:$0xff]  }
0x165d   : > { %v3972_v40 = vmax.f32 %v3897_v26, 0.0  ;;  %v3974_v41 = vmax.f32 %v3940_v27, 0.0  ;;  %5864 = vmatprep.subr.bf16.mxu0 %v6294_v19  ;;  %5886 = vmatprep.subr.bf16.mxu1 %v6295_v21  ;;  %v6320_v34 = vld [vmem:[%s6574_s16 + $0x218] sm:$0xff]   ;;  %v6324_v63 = vld [vmem:[%s6574_s16 + $0x220] sm:$0xff]   ;;  %v6327_v8 = vld [vmem:[%s6574_s16 + $0x2e8] sm:$0xff]  }
0x165e   : > { %v3973_v43 = vmax.f32 %v3899_v38, 0.0  ;;  %v3975_v44 = vmax.f32 %v3942_v33, 0.0  ;;  %v6321_v56 = vld [vmem:[%s6574_s16 + $0x298] sm:$0xff]   ;;  %v6325_v6 = vld [vmem:[%s6574_s16 + $0x2a0] sm:$0xff]   ;;  %v6328_v9 = vld [vmem:[%s6574_s16 + $0x228] sm:$0xff]  }
0x165f   : > { %v7087_v45 = vpack.c.bf16 %v3972_v40, %v3956_v37  ;;  %v7089_v46 = vpack.c.bf16 %v3974_v41, %v3958_v39  ;;  %v6329_v16 = vld [vmem:[%s6574_s16 + $0x2a8] sm:$0xff]   ;;  %v6330_v18 = vld [vmem:[%s6574_s16 + $0x270] sm:$0xff]   ;;  %v6334_v23 = vld [vmem:[%s6574_s16 + $0x278] sm:$0xff]  }
0x1660   : > { %v7091_v48 = vpack.c.bf16 %v3973_v43, %v3957_v42  ;;  %v7093_v50 = vpack.c.bf16 %v3975_v44, %v3959_v47  ;;  %5865 = vmatpush3.bf16.msra.mxu0 %v6296_v35  ;;  %5887 = vmatpush3.bf16.msra.mxu1 %v6297_v29  ;;  %v6331_v5 = vld [vmem:[%s6574_s16 + $0x2f0] sm:$0xff]   ;;  %v6335_v25 = vld [vmem:[%s6574_s16 + $0x2f8] sm:$0xff]   ;;  %v6338_v26 = vld [vmem:[%s6574_s16 + $0x340] sm:$0xff]  }
0x1661   : > { %5866 = vmatprep.subr.bf16.mxu0 %v6298_v49  ;;  %5888 = vmatprep.subr.bf16.mxu1 %v6299_v4  ;;  %v6332_v19 = vld [vmem:[%s6574_s16 + $0x230] sm:$0xff]   ;;  %v6336_v3 = vld [vmem:[%s6574_s16 + $0x238] sm:$0xff]   ;;  %v6339_v27 = vld [vmem:[%s6574_s16 + $0x3c0] sm:$0xff]  }
0x1662   : > { %v6333_v21 = vld [vmem:[%s6574_s16 + $0x2b0] sm:$0xff]   ;;  %v6337_v36 = vld [vmem:[%s6574_s16 + $0x2b8] sm:$0xff]   ;;  %v6340_v28 = vld [vmem:[%s6574_s16 + $0x300] sm:$0xff]  }
0x1663   : > { %v6341_v30 = vld [vmem:[%s6574_s16 + $0x380] sm:$0xff]   ;;  %v6342_v38 = vld [vmem:[%s6574_s16 + $0x348] sm:$0xff]   ;;  %v6346_v37 = vld [vmem:[%s6574_s16 + $0x350] sm:$0xff]  }
0x1664   : > { %5867 = vmatpush3.bf16.msra.mxu0 %v6300_v51  ;;  %5889 = vmatpush3.bf16.msra.mxu1 %v6301_v52  ;;  %v6343_v33 = vld [vmem:[%s6574_s16 + $0x3c8] sm:$0xff]   ;;  %v6349_v39 = vld [vmem:[%s6574_s16 + $0x390] sm:$0xff]   ;;  %v6350_v40 = vld [vmem:[%s6574_s16 + $0x358] sm:$0xff]  }
0x1665   : > { %5868 = vmatprep.subr.bf16.mxu0 %v6302_v53  ;;  %5890 = vmatprep.subr.bf16.mxu1 %v6303_v54  ;;  %v6344_v35 = vld [vmem:[%s6574_s16 + $0x308] sm:$0xff]   ;;  %v6351_v41 = vld [vmem:[%s6574_s16 + $0x3d8] sm:$0xff]   ;;  %v6354_v42 = vld [vmem:[%s6574_s16 + $0x360] sm:$0xff]  }
0x1666   : > { %v6345_v29 = vld [vmem:[%s6574_s16 + $0x388] sm:$0xff]   ;;  %v6352_v49 = vld [vmem:[%s6574_s16 + $0x318] sm:$0xff]   ;;  %v6355_v47 = vld [vmem:[%s6574_s16 + $0x3e0] sm:$0xff]  }
0x1667   : > { %v6353_v4 = vld [vmem:[%s6574_s16 + $0x398] sm:$0xff]   ;;  %v6356_v43 = vld [vmem:[%s6574_s16 + $0x320] sm:$0xff]   ;;  %v6360_v51 = vld [vmem:[%s6574_s16 + $0x328] sm:$0xff]  }
0x1668   : > { %5869 = vmatpush3.bf16.msra.mxu0 %v6304_v55  ;;  %5891 = vmatpush3.bf16.msra.mxu1 %v6305_v0  ;;  %v6357_v44 = vld [vmem:[%s6574_s16 + $0x3a0] sm:$0xff]   ;;  %v6361_v52 = vld [vmem:[%s6574_s16 + $0x3a8] sm:$0xff]   ;;  %v6362_v53 = vld [vmem:[%s6574_s16 + $0x370] sm:$0xff]  }
0x1669   : > { %5898 = vmatprep.subr.bf16.mxu0 %v6306_v10  ;;  %5920 = vmatprep.subr.bf16.mxu1 %v6307_v1  ;;  %v6363_v54 = vld [vmem:[%s6574_s16 + $0x3f0] sm:$0xff]   ;;  %v6366_v10 = vld [vmem:[%s6574_s16 + $0x378] sm:$0xff]  }
0x166a   : > { %v6364_v55 = vld [vmem:[%s6574_s16 + $0x330] sm:$0xff]   ;;  %v6367_v1 = vld [vmem:[%s6574_s16 + $0x3f8] sm:$0xff]  }
0x166b   : > { %5136 = vmatmul.mubr.bf16.vlgmr.msra.gmra.mrb[56].mxu0 %v7048_v31  ;;  %5177 = vmatmul.mubr.bf16.vlgmr.msra.gmra.mrb[60].mxu1 %v7050_v32  ;;  %v6315_v31 = vld [vmem:[%s6574_s16 + $0x2d0] sm:$0xff]  }
0x166c   : > { %5899 = vmatpush3.bf16.msra.mxu0 %v6308_v2  ;;  %5217 = vmatprep.mubr.bf16.mxu0 %v7073_v17  ;;  %v6316_v32 = vld [vmem:[%s6574_s16 + $0x210] sm:$0xff]   ;;  %v6322_v17 = vld [vmem:[%s6574_s16 + $0x260] sm:$0xff]   ;;  %v6368_v2 = vld [vmem:[%s6574_s16 + $0x338] sm:$0xff]  }
0x166d   : > { %5921 = vmatpush3.bf16.msra.mxu1 %v6309_v20  ;;  %5258 = vmatprep.mubr.bf16.mxu1 %v7075_v13  ;;  %v6323_v13 = vld [vmem:[%s6574_s16 + $0x2e0] sm:$0xff]   ;;  %v6365_v0 = vld [vmem:[%s6574_s16 + $0x3b0] sm:$0xff]   ;;  %v6369_v20 = vld [vmem:[%s6574_s16 + $0x3b8] sm:$0xff]  }
0x166e   : > { %5900 = vmatprep.subr.bf16.mxu0 %v6310_v22  ;;  %5922 = vmatprep.subr.bf16.mxu1 %v6311_v24 }
0x1670   : > { %5901 = vmatpush3.bf16.msra.mxu0 %v6312_v57  ;;  %v5603_v57 = vld [vmem:[%s6558_s22 + $0x5] ss:$0 sm:$0xff] }
0x1671   : > { %5923 = vmatpush3.bf16.msra.mxu1 %v6313_v59  ;;  %5902 = vmatprep.subr.bf16.mxu0 %v6314_v7 }
0x1672   : > { %5924 = vmatprep.subr.bf16.mxu1 %v6315_v31 }
0x1674   : > { %5903 = vmatpush3.bf16.msra.mxu0 %v6316_v32 }
0x1675   : > { %5925 = vmatpush3.bf16.msra.mxu1 %v6317_v11  ;;  %5904 = vmatprep.subr.bf16.mxu0 %v6318_v61 }
0x1676   : > { %5926 = vmatprep.subr.bf16.mxu1 %v6319_v15 }
0x1678   : > { %5905 = vmatpush3.bf16.msra.mxu0 %v6320_v34 }
0x1679   : > { %5927 = vmatpush3.bf16.msra.mxu1 %v6321_v56  ;;  %5906 = vmatprep.subr.bf16.mxu0 %v6322_v17 }
0x167a   : > { %5928 = vmatprep.subr.bf16.mxu1 %v6323_v13 }
0x167c   : > { %5907 = vmatpush3.bf16.msra.mxu0 %v6324_v63 }
0x167d   : > { %5929 = vmatpush3.bf16.msra.mxu1 %v6325_v6  ;;  %5908 = vmatprep.subr.bf16.mxu0 %v6326_v14 }
0x167e   : > { %5930 = vmatprep.subr.bf16.mxu1 %v6327_v8 }
0x1680   : > { %5909 = vmatpush3.bf16.msra.mxu0 %v6328_v9 }
0x1681   : > { %5931 = vmatpush3.bf16.msra.mxu1 %v6329_v16  ;;  %5910 = vmatprep.subr.bf16.mxu0 %v6330_v18 }
0x1682   : > { %5932 = vmatprep.subr.bf16.mxu1 %v6331_v5 }
0x1684   : > { %5911 = vmatpush3.bf16.msra.mxu0 %v6332_v19 }
0x1685   : > { %5933 = vmatpush3.bf16.msra.mxu1 %v6333_v21  ;;  %5912 = vmatprep.subr.bf16.mxu0 %v6334_v23 }
0x1686   : > { %5934 = vmatprep.subr.bf16.mxu1 %v6335_v25 }
0x1688   : > { %5913 = vmatpush3.bf16.msra.mxu0 %v6336_v3 }
0x1689   : > { %5935 = vmatpush3.bf16.msra.mxu1 %v6337_v36  ;;  %5942 = vmatprep.subr.bf16.mxu0 %v6338_v26 }
0x168a   : > { %5964 = vmatprep.subr.bf16.mxu1 %v6339_v27 }
0x168b   : > { %5218 = vmatmul.mubr.bf16.vlgmr.msra.gmra.mrb[60].mxu0 %v7069_v60  ;;  %v6347_v60 = vld [vmem:[%s6574_s16 + $0x3d0] sm:$0xff]  }
0x168c   : > { %5259 = vmatmul.mubr.bf16.vlgmr.msra.gmra.mrb[64].mxu1 %v7071_v12  ;;  %5943 = vmatpush3.bf16.msra.mxu0 %v6340_v28  ;;  %v6348_v12 = vld [vmem:[%s6574_s16 + $0x310] sm:$0xff]  }
0x168d   : > { %5299 = vmatprep.mubr.bf16.mxu0 %v7091_v48  ;;  %5965 = vmatpush3.bf16.msra.mxu1 %v6341_v30  ;;  %v6358_v48 = vld [vmem:[%s6574_s16 + $0x368] sm:$0xff]  }
0x168e   : > { %5340 = vmatprep.mubr.bf16.mxu1 %v7093_v50  ;;  %5944 = vmatprep.subr.bf16.mxu0 %v6342_v38  ;;  %v6359_v50 = vld [vmem:[%s6574_s16 + $0x3e8] sm:$0xff]  }
0x168f   : > { %5966 = vmatprep.subr.bf16.mxu1 %v6343_v33 }
0x1690   : > { %5945 = vmatpush3.bf16.msra.mxu0 %v6344_v35 }
0x1691   : > { %5967 = vmatpush3.bf16.msra.mxu1 %v6345_v29  ;;  %5946 = vmatprep.subr.bf16.mxu0 %v6346_v37 }
0x1692   : > { %5968 = vmatprep.subr.bf16.mxu1 %v6347_v60 }
0x1694   : > { %5947 = vmatpush3.bf16.msra.mxu0 %v6348_v12 }
0x1695   : > { %5969 = vmatpush3.bf16.msra.mxu1 %v6349_v39  ;;  %5948 = vmatprep.subr.bf16.mxu0 %v6350_v40 }
0x1696   : > { %5970 = vmatprep.subr.bf16.mxu1 %v6351_v41 }
0x1698   : > { %5949 = vmatpush3.bf16.msra.mxu0 %v6352_v49 }
0x1699   : > { %5971 = vmatpush3.bf16.msra.mxu1 %v6353_v4  ;;  %5950 = vmatprep.subr.bf16.mxu0 %v6354_v42 }
0x169a   : > { %5972 = vmatprep.subr.bf16.mxu1 %v6355_v47 }
0x169c   : > { %5951 = vmatpush3.bf16.msra.mxu0 %v6356_v43 }
0x169d   : > { %5973 = vmatpush3.bf16.msra.mxu1 %v6357_v44  ;;  %5952 = vmatprep.subr.bf16.mxu0 %v6358_v48 }
0x169e   : > { %5974 = vmatprep.subr.bf16.mxu1 %v6359_v50 }
0x16a0   : > { %5953 = vmatpush3.bf16.msra.mxu0 %v6360_v51 }
0x16a1   : > { %5975 = vmatpush3.bf16.msra.mxu1 %v6361_v52  ;;  %5954 = vmatprep.subr.bf16.mxu0 %v6362_v53 }
0x16a2   : > { %5976 = vmatprep.subr.bf16.mxu1 %v6363_v54 }
0x16a4   : > { %5955 = vmatpush3.bf16.msra.mxu0 %v6364_v55 }
0x16a5   : > { %5977 = vmatpush3.bf16.msra.mxu1 %v6365_v0  ;;  %5956 = vmatprep.subr.bf16.mxu0 %v6366_v10 }
0x16a6   : > { %5978 = vmatprep.subr.bf16.mxu1 %v6367_v1 }
0x16a8   : > { %5957 = vmatpush3.bf16.msra.mxu0 %v6368_v2 }
0x16a9   : > { %5979 = vmatpush3.bf16.msra.mxu1 %v6369_v20 }
0x16ab   : > { %5300 = vmatmul.mubr.bf16.vlgmr.msra.gmra.mrb[64].mxu0 %v7087_v45 }
0x16ac   : > { %5341 = vmatmul.mubr.bf16.vlgmr.msra.gmra.mrb[68].mxu1 %v7089_v46 }
0x171e   : > { %v5826_v22 = vpop.f32.mrb[52].mxu0  ;;  %v5848_v24 = vpop.f32.mrb[56].mxu1 }
0x171f   : > { %v5827_v59 = vpop.f32.mrb[53].mxu0  ;;  %v5849_v7 = vpop.f32.mrb[57].mxu1 }
0x1720   : > { %v5828_v31 = vadd.f32 %v5827_v59, %v5826_v22  ;;  %v5850_v32 = vadd.f32 %v5849_v7, %v5848_v24  ;;  %v5829_v11 = vpop.f32.mrb[54].mxu0  ;;  %v5851_v61 = vpop.f32.mrb[58].mxu1 }
0x1721   : > { %v5830_v15 = vpop.f32.mrb[55].mxu0  ;;  %v5852_v34 = vpop.f32.mrb[59].mxu1 }
0x1722   : > { %v5056_v56 = vadd.f32 %v5828_v31, %v5603_v57  ;;  %v5831_v17 = vadd.f32 %v5830_v15, %v5829_v11  ;;  %v5853_v13 = vadd.f32 %v5852_v34, %v5851_v61 }
0x1724   : > { %v5097_v63 = vadd.f32 %v5850_v32, %v5056_v56  ;;  %v5059_v6 = vadd.f32 %v5831_v17, %v5603_v57 }
0x1726   : > { %v5100_v14 = vadd.f32 %v5853_v13, %v5059_v6 }
0x173e   : > { %v5870_v45 = vpop.f32.mrb[56].mxu0  ;;  %v5892_v8 = vpop.f32.mrb[60].mxu1 }
0x173f   : > { %v5871_v46 = vpop.f32.mrb[57].mxu0  ;;  %v5893_v9 = vpop.f32.mrb[61].mxu1 }
0x1740   : > { %v5872_v16 = vadd.f32 %v5871_v46, %v5870_v45  ;;  %v5894_v18 = vadd.f32 %v5893_v9, %v5892_v8  ;;  %v5873_v5 = vpop.f32.mrb[58].mxu0  ;;  %v5895_v19 = vpop.f32.mrb[62].mxu1 }
0x1741   : > { %v5874_v21 = vpop.f32.mrb[59].mxu0  ;;  %v5896_v23 = vpop.f32.mrb[63].mxu1 }
0x1742   : > { %v5138_v25 = vadd.f32 %v5872_v16, %v5097_v63  ;;  %v5875_v3 = vadd.f32 %v5874_v21, %v5873_v5  ;;  %v5897_v36 = vadd.f32 %v5896_v23, %v5895_v19  ;;  %v5733_v21 = vld [vmem:[%s6558_s22 + $0x4] ss:$0 sm:$0xff] }
0x1744   : > { %v5179_v26 = vadd.f32 %v5894_v18, %v5138_v25  ;;  %v5141_v27 = vadd.f32 %v5875_v3, %v5100_v14  ;;  %v5732_v18 = vld [vmem:[%s6558_s22 + $0x3] ss:$0 sm:$0xff] }
0x1746   : > { %v5182_v28 = vadd.f32 %v5897_v36, %v5141_v27 }
0x175e   : > { %v5914_v30 = vpop.f32.mrb[60].mxu0 }
0x175f   : > { %v5936_v38 = vpop.f32.mrb[64].mxu1  ;;  %v5915_v33 = vpop.f32.mrb[61].mxu0 }
0x1760   : > { %v5916_v35 = vadd.f32 %v5915_v33, %v5914_v30  ;;  %v5937_v29 = vpop.f32.mrb[65].mxu1  ;;  %v5917_v37 = vpop.f32.mrb[62].mxu0 }
0x1761   : > { %v5938_v60 = vadd.f32 %v5937_v29, %v5936_v38  ;;  %v5939_v12 = vpop.f32.mrb[66].mxu1  ;;  %v5918_v39 = vpop.f32.mrb[63].mxu0 }
0x1762   : > { %v5220_v40 = vadd.f32 %v5916_v35, %v5179_v26  ;;  %v5919_v41 = vadd.f32 %v5918_v39, %v5917_v37  ;;  %v5940_v49 = vpop.f32.mrb[67].mxu1 }
0x1763   : > { %v5941_v4 = vadd.f32 %v5940_v49, %v5939_v12 }
0x1764   : > { %v5261_v42 = vadd.f32 %v5938_v60, %v5220_v40  ;;  %v5223_v47 = vadd.f32 %v5919_v41, %v5182_v28 }
0x1766   : > { %v5264_v43 = vadd.f32 %v5941_v4, %v5223_v47 }
0x177e   : > { %v5958_v44 = vpop.f32.mrb[64].mxu0 }
0x177f   : > { %v5980_v48 = vpop.f32.mrb[68].mxu1  ;;  %v5959_v50 = vpop.f32.mrb[65].mxu0 }
0x1780   : > { %v5960_v51 = vadd.f32 %v5959_v50, %v5958_v44  ;;  %v5981_v52 = vpop.f32.mrb[69].mxu1  ;;  %v5961_v53 = vpop.f32.mrb[66].mxu0 }
0x1781   : > { %v5982_v54 = vadd.f32 %v5981_v52, %v5980_v48  ;;  %v5983_v55 = vpop.f32.mrb[70].mxu1  ;;  %v5962_v0 = vpop.f32.mrb[67].mxu0 }
0x1782   : > { %v5302_v10 = vadd.f32 %v5960_v51, %v5261_v42  ;;  %v5963_v1 = vadd.f32 %v5962_v0, %v5961_v53  ;;  %v5984_v2 = vpop.f32.mrb[71].mxu1 }
0x1783   : > { %v5985_v20 = vadd.f32 %v5984_v2, %v5983_v55 }
0x1784   : > { %v5343_v22 = vadd.f32 %v5982_v54, %v5302_v10  ;;  %v5305_v24 = vadd.f32 %v5963_v1, %v5264_v43 }
0x1786   : > { %v5346_v57 = vadd.f32 %v5985_v20, %v5305_v24  ;;  %v5349_v59 = vadd.f32 %v5343_v22, %v6925_v58 }
0x1788   : > { %v5353_v7 = vsel %vm435_vm2, %v5349_v59, 0.0  ;;  %v5350_v31 = vadd.f32 %v5346_v57, %v6927_v62 }
0x1789   : > { %5354 = vadd.xlane.f32.xlu0 %v5353_v7 }
0x178a   : > { %v5356_v32 = vsel %vm435_vm2, %v5350_v31, 0.0 }
0x178b   : > { %5357 = vadd.xlane.f32.xlu1 %v5356_v32 }
0x1816   : > { %v5355_v11 = vpop.xlane.xlu0 %5354 }
0x1817   : > { %v5359_v61 = vmul.f32 0.03125, %v5355_v11 }
0x1818   : > { %v5358_v15 = vpop.xlane.xlu1 %5357 }
0x1819   : > { %v5361_v34 = vsub.f32 %v5349_v59, %v5359_v61  ;;  %v5360_v56 = vmul.f32 0.03125, %v5358_v15 }
0x181b   : > { %v5362_v17 = vsub.f32 %v5350_v31, %v5360_v56  ;;  %v5363_v13 = vmul.f32 %v5361_v34, %v5361_v34 }
0x181d   : > { %v5365_v63 = vsel %vm435_vm2, %v5363_v13, 0.0  ;;  %v5364_v6 = vmul.f32 %v5362_v17, %v5362_v17 }
0x181e   : > { %5366 = vadd.xlane.f32.xlu0 %v5365_v63 }
0x181f   : > { %v5368_v58 = vsel %vm435_vm2, %v5364_v6, 0.0 }
0x1820   : > { %5369 = vadd.xlane.f32.xlu1 %v5368_v58 }
0x18ab   : > { %v5367_v62 = vpop.xlane.xlu0 %5366 }
0x18ac   : > { %v5371_v14 = vmul.f32 0.03125, %v5367_v62 }
0x18ad   : > { %v5370_v45 = vpop.xlane.xlu1 %5369 }
0x18ae   : > { %v5373_v8 = vadd.f32 1e-05, %v5371_v14  ;;  %v5372_v46 = vmul.f32 0.03125, %v5370_v45 }
0x18b0   : > { %6438 = vrsqrt.f32 %v5373_v8  ;;  %v5374_v9 = vadd.f32 1e-05, %v5372_v46 }
0x18b2   : > { %6440 = vrsqrt.f32 %v5374_v9 }
0x18ba   : > { %v6439_v16 = vpop.eup %6438 }
0x18bb   : > { %v5377_v5 = vmul.f32 %v6439_v16, %v5361_v34 }
0x18bc   : > { %v6441_v19 = vpop.eup %6440 }
0x18bd   : > { %v5383_v23 = vmul.f32 %v5732_v18, %v5377_v5  ;;  %v5378_v25 = vmul.f32 %v6441_v19, %v5362_v17 }
0x18bf   : > { %v5389_v3 = vadd.f32 %v5733_v21, %v5383_v23  ;;  %v5384_v36 = vmul.f32 %v5732_v18, %v5378_v25 }
0x18c1   : > { %5391 = vst.msk [vmem:[%s7203_s8] sm:$0xff] %vm435_vm2, %v5389_v3  ;;  %v5390_v26 = vadd.f32 %v5733_v21, %v5384_v36 }
0x18c3   : > { %5392 = vst.msk [vmem:[%s7203_s8 + $0x8] sm:$0xff] %vm435_vm2, %v5390_v26 }
0x18c4 PF: > { %s18_s27 = sadd.s32 1, %s6450_s27  }
0x18c5   : > { %p15_p5 = scmp.ge.s32.totalorder %s18_s27, 4  }
0x18c7   :  { %17 = sbr.rel (!%p15_p5) target bundleno = 1 (0x1), region = 100 }

</bundles_post_ra>
